<compile_context>
chip_gen: v7x
topology: tpu7x:2x2x1
jax: 0.10.0
libtpu: 0.0.40
codegen_flags: <defaults>
</compile_context>

<pallas_src>
from functools import partial

import jax
import jax.numpy as jnp
from jax.experimental import pallas as pl
from jax.experimental.pallas import tpu as pltpu


def _round_up(x, m):
    return (x + m - 1) // m * m


def _sigmoid(x):
    # Exact: sigmoid(x) = 0.5 * (1 + tanh(x/2)); one EUP push instead of two.
    return 0.5 * jnp.tanh(0.5 * x) + 0.5


# ----------------------------- Pallas kernel -------------------------------

def _make_kernel(S, B, Bp, Hp):
    """Embedding gather + LSTM recurrence + FC, one invocation, fully unrolled."""

    def kernel(ids_ref, emb_ref, w_ih_ref, w_hh_ref, b_ref, w_fc_ref, b_fc_ref,
               out_ref, x_scr, xproj_scr, hall_scr):
        # ids_ref   : (S*B,)        int32 SMEM   token ids, time-major
        # emb_ref   : (vocab, Ip)   f32   VMEM   lane-padded embedding table
        # w_ih_ref  : (Ip, 4*Hp)    bf16  VMEM   input->gates (gate order i,f,g,o)
        # w_hh_ref  : (Hp, 4*Hp)    bf16  VMEM   hidden->gates
        # b_ref     : (1, 4*Hp)     f32   VMEM   b_ih + b_hh (folded)
        # w_fc_ref  : (Hp, Op)      bf16  VMEM   fc weight
        # b_fc_ref  : (1, Op)       f32   VMEM   fc bias
        # out_ref   : (S*Bp, Op)    f32   VMEM   fc(h_t) for every (t, b) slab
        # x_scr     : (S*Bp, Ip)    f32          gathered embeddings
        # xproj_scr : (S*Bp, 4*Hp)  f32          x @ W_ih^T + bias
        # hall_scr  : (S*Bp, Hp)    bf16         all h_t (FC matmul LHS)

        # ---- prologue 1: in-kernel embedding gather (rows b>=B stay zero) ----
        x_scr[...] = jnp.zeros_like(x_scr)
        for t in range(S):
            for b in range(B):
                tok = ids_ref[t * B + b]                       # SMEM scalar read
                x_scr[pl.ds(t * Bp + b, 1), :] = emb_ref[pl.ds(tok, 1), :]

        # ---- prologue 2: time-parallel input projection + bias fold,
        #      ONE MXU matmul; nothing but h @ W_hh + gate math left per step ----
        xproj_scr[...] = (
            jnp.dot(x_scr[...].astype(jnp.bfloat16), w_ih_ref[...],
                    preferred_element_type=jnp.float32)
            + b_ref[...])

        # ---- fully unrolled recurrence; h (bf16) and c (f32) live in vregs ----
        h_bf = jnp.zeros((Bp, Hp), jnp.bfloat16)
        c = jnp.zeros((Bp, Hp), jnp.float32)
        for t in range(S):
            row = t * Bp                                       # static, 8-aligned
            gates = (xproj_scr[pl.ds(row, Bp), :]
                     + jnp.dot(h_bf, w_hh_ref[...],
                               preferred_element_type=jnp.float32))   # (Bp, 4Hp)
            # lane-aligned whole-vreg gate views (Hp is a multiple of 128)
            i_g = _sigmoid(gates[:, 0 * Hp:1 * Hp])
            f_g = _sigmoid(gates[:, 1 * Hp:2 * Hp])
            g_g = jnp.tanh(gates[:, 2 * Hp:3 * Hp])
            o_g = _sigmoid(gates[:, 3 * Hp:4 * Hp])

            c = f_g * c + i_g * g_g
            h_bf = (o_g * jnp.tanh(c)).astype(jnp.bfloat16)
            hall_scr[pl.ds(row, Bp), :] = h_bf                 # off critical path

        # ---- epilogue: fused FC over every step, ONE MXU matmul,
        #      single lane-dense (Op = 128) output store ----
        out_ref[...] = (
            jnp.dot(hall_scr[...], w_fc_ref[...],
                    preferred_element_type=jnp.float32)
            + b_fc_ref[...]).astype(out_ref.dtype)

    return kernel


def lstm_tagger_pallas(ids_flat, emb_p, w_ih_p, w_hh_p, b_p, w_fc_p, b_fc_p,
                       *, S, B, Bp):
    """ids_flat: (S*B,) int32 -> (S*Bp, Op) f32 logits (padded rows/lanes)."""
    Hp = w_hh_p.shape[0]
    Op = w_fc_p.shape[1]
    kernel = _make_kernel(S, B, Bp, Hp)

    vmem = pl.BlockSpec(memory_space=pltpu.MemorySpace.VMEM)
    smem = pl.BlockSpec(memory_space=pltpu.MemorySpace.SMEM)

    # No grid / no pipelining: total working set (weights + scratch) < 0.5 MiB,
    # far below every generation's VMEM (incl. v7x's 64 MiB).
    return pl.pallas_call(
        kernel,
        out_shape=jax.ShapeDtypeStruct((S * Bp, Op), jnp.float32),
        in_specs=[smem, vmem, vmem, vmem, vmem, vmem, vmem],
        out_specs=vmem,
        scratch_shapes=[
            pltpu.VMEM((S * Bp, Ip_from(emb_p)), jnp.float32),  # gathered x
            pltpu.VMEM((S * Bp, 4 * Hp), jnp.float32),          # x proj (+bias)
            pltpu.VMEM((S * Bp, Hp), jnp.bfloat16),             # all h_t
        ],
    )(ids_flat, emb_p, w_ih_p, w_hh_p, b_p, w_fc_p, b_fc_p)


def Ip_from(emb_p):
    return emb_p.shape[1]


# ------------------------------- Module glue --------------------------------

def init_params(key, vocab_size, input_size, hidden_size, output_size):
    ks = jax.random.split(key, 7)
    scale = 0.1
    emb = scale * jax.random.normal(ks[0], (vocab_size, input_size), jnp.float32)
    emb = emb.at[0].set(0.0)   # padding_idx=0

    w_ih = scale * jax.random.normal(ks[1], (4 * hidden_size, input_size), jnp.float32)
    w_hh = scale * jax.random.normal(ks[2], (4 * hidden_size, hidden_size), jnp.float32)
    b_ih = scale * jax.random.normal(ks[3], (4 * hidden_size,), jnp.float32)
    b_hh = scale * jax.random.normal(ks[4], (4 * hidden_size,), jnp.float32)

    w_fc = scale * jax.random.normal(ks[5], (output_size, hidden_size), jnp.float32)
    b_fc = scale * jax.random.normal(ks[6], (output_size,), jnp.float32)

    return dict(emb=emb, w_ih=w_ih, w_hh=w_hh, b_ih=b_ih, b_hh=b_hh,
                w_fc=w_fc, b_fc=b_fc)


def prepare_params(params):
    """One-time weight prep: transpose, per-gate lane-pad, bias fold, bf16 cast."""
    I = params["emb"].shape[1]
    H = params["w_hh"].shape[1]
    O = params["w_fc"].shape[0]
    Ip = _round_up(I, 128)
    Hp = _round_up(H, 128)
    Op = _round_up(O, 128)

    emb_p = jnp.pad(params["emb"], ((0, 0), (0, Ip - I))).astype(jnp.float32)

    # PyTorch LSTM gate order along the 4H axis is (i, f, g, o).
    w_ih_t = params["w_ih"].T.reshape(I, 4, H)
    w_ih_p = jnp.pad(w_ih_t, ((0, Ip - I), (0, 0), (0, Hp - H))).reshape(Ip, 4 * Hp)

    w_hh_t = params["w_hh"].T.reshape(H, 4, H)
    w_hh_p = jnp.pad(w_hh_t, ((0, Hp - H), (0, 0), (0, Hp - H))).reshape(Hp, 4 * Hp)

    b = (params["b_ih"] + params["b_hh"]).reshape(4, H)
    b_p = jnp.pad(b, ((0, 0), (0, Hp - H))).reshape(1, 4 * Hp)

    w_fc_p = jnp.pad(params["w_fc"].T, ((0, Hp - H), (0, Op - O)))
    b_fc_p = jnp.pad(params["b_fc"], (0, Op - O)).reshape(1, Op)

    return dict(
        emb=emb_p,
        w_ih=w_ih_p.astype(jnp.bfloat16),
        w_hh=w_hh_p.astype(jnp.bfloat16),
        b=b_p.astype(jnp.float32),
        w_fc=w_fc_p.astype(jnp.bfloat16),
        b_fc=b_fc_p.astype(jnp.float32),
    )


@partial(jax.jit, static_argnames=("out_size",))
def seq2seq_forward(prepped, input_seq, out_size):
    """input_seq: (S, B) int32 -> (S, B, out_size) float32."""
    S, B = input_seq.shape
    Bp = _round_up(B, 8)                       # sublane-align per-step tiles
    ids_flat = input_seq.reshape(S * B).astype(jnp.int32)

    out_p = lstm_tagger_pallas(
        ids_flat, prepped["emb"], prepped["w_ih"], prepped["w_hh"],
        prepped["b"], prepped["w_fc"], prepped["b_fc"],
        S=S, B=B, Bp=Bp)                       # (S*Bp, Op)

    Op = out_p.shape[1]
    return out_p.reshape(S, Bp, Op)[:, :B, :out_size]


def seq2seq_reference(params, input_seq):
    """Pure-JAX f32 reference matching torch.nn.LSTM semantics (gates i,f,g,o)."""
    H = params["w_hh"].shape[1]
    embedded = jnp.take(params["emb"], input_seq, axis=0)
    B = embedded.shape[1]

    def step(carry, x_t):
        h, c = carry
        gates = (x_t @ params["w_ih"].T + params["b_ih"]
                 + h @ params["w_hh"].T + params["b_hh"])
        i = jax.nn.sigmoid(gates[:, 0 * H:1 * H])
        f = jax.nn.sigmoid(gates[:, 1 * H:2 * H])
        g = jnp.tanh(gates[:, 2 * H:3 * H])
        o = jax.nn.sigmoid(gates[:, 3 * H:4 * H])
        c_new = f * c + i * g
        h_new = o * jnp.tanh(c_new)
        return (h_new, c_new), h_new

    h0 = jnp.zeros((B, H), jnp.float32)
    c0 = jnp.zeros((B, H), jnp.float32)
    _, hs = jax.lax.scan(step, (h0, c0), embedded)
    return hs @ params["w_fc"].T + params["b_fc"]


# ----------------------------------- Main ------------------------------------

if __name__ == "__main__":
    seq_len = 8
    batch = 2
    input_size = 80      # embedding dim (module constant)
    hidden_size = 50
    vocab_size = 30
    output_size = 10

    key = jax.random.PRNGKey(0)
    k_params, k_data = jax.random.split(key)

    params = init_params(k_params, vocab_size, input_size, hidden_size, output_size)
    prepped = prepare_params(params)           # one-time; not on the per-call path

    input_seq = jax.random.randint(k_data, (seq_len, batch), 0, vocab_size,
                                   dtype=jnp.int32)

    out = jax.block_until_ready(seq2seq_forward(prepped, input_seq, output_size))
    ref = jax.block_until_ready(seq2seq_reference(params, input_seq))

    assert out.shape == (seq_len, batch, output_size)
    # bf16 MXU operands (f32 accumulation) + per-step bf16 h feedback ->
    # slightly looser tolerance than pure f32; exact-zero lane padding proven.
    assert jnp.allclose(out, ref, atol=2e-2, rtol=2e-2), "Pallas output mismatch vs reference"

    print("KERNEL_OK")
</pallas_src>

<mosaic_0001>
module attributes {stable_mosaic.version = 11 : i64} {
  func.func @kernel(%arg0: memref<16xi32, #tpu.memory_space<smem>>, %arg1: memref<30x128xf32, #tpu.memory_space<vmem>>, %arg2: memref<128x512xbf16, #tpu.memory_space<vmem>>, %arg3: memref<128x512xbf16, #tpu.memory_space<vmem>>, %arg4: memref<1x512xf32, #tpu.memory_space<vmem>>, %arg5: memref<128x128xbf16, #tpu.memory_space<vmem>>, %arg6: memref<1x128xf32, #tpu.memory_space<vmem>>, %arg7: memref<64x128xf32, #tpu.memory_space<vmem>>, %arg8: memref<64x128xf32, #tpu.memory_space<vmem>>, %arg9: memref<64x512xf32, #tpu.memory_space<vmem>>, %arg10: memref<64x128xbf16, #tpu.memory_space<vmem>>) attributes {dimension_semantics = [], scalar_prefetch = 0 : i64, scratch_operands = 3 : i64, tpu.core_type = #tpu.core_type<tc>} {
    %cst = arith.constant 0.000000e+00 : f32
    %0 = vector.broadcast %cst : f32 to vector<64x128xf32>
    %c0 = arith.constant 0 : index
    %c0_0 = arith.constant 0 : index
    %1 = vector.load %arg8[%c0, %c0_0] : memref<64x128xf32, #tpu.memory_space<vmem>>, vector<64x128xf32>
    tpu.vector_store %arg8[%c0, %c0_0], %0 {strides = array<i32>} : memref<64x128xf32, #tpu.memory_space<vmem>>, vector<64x128xf32>,
    %c0_1 = arith.constant 0 : index
    %2 = memref.load %arg0[%c0_1] : memref<16xi32, #tpu.memory_space<smem>>
    %3 = arith.index_cast %2 : i32 to index
    %c0_2 = arith.constant 0 : index
    %4 = vector.load %arg1[%3, %c0_2] : memref<30x128xf32, #tpu.memory_space<vmem>>, vector<1x128xf32>
    %c0_3 = arith.constant 0 : index
    %c0_4 = arith.constant 0 : index
    %5 = vector.load %arg8[%c0_3, %c0_4] : memref<64x128xf32, #tpu.memory_space<vmem>>, vector<1x128xf32>
    tpu.vector_store %arg8[%c0_3, %c0_4], %4 {strides = array<i32>} : memref<64x128xf32, #tpu.memory_space<vmem>>, vector<1x128xf32>,
    %c1 = arith.constant 1 : index
    %6 = memref.load %arg0[%c1] : memref<16xi32, #tpu.memory_space<smem>>
    %7 = arith.index_cast %6 : i32 to index
    %c0_5 = arith.constant 0 : index
    %8 = vector.load %arg1[%7, %c0_5] : memref<30x128xf32, #tpu.memory_space<vmem>>, vector<1x128xf32>
    %c1_6 = arith.constant 1 : index
    %c0_7 = arith.constant 0 : index
    %9 = vector.load %arg8[%c1_6, %c0_7] : memref<64x128xf32, #tpu.memory_space<vmem>>, vector<1x128xf32>
    tpu.vector_store %arg8[%c1_6, %c0_7], %8 {strides = array<i32>} : memref<64x128xf32, #tpu.memory_space<vmem>>, vector<1x128xf32>,
    %c2 = arith.constant 2 : index
    %10 = memref.load %arg0[%c2] : memref<16xi32, #tpu.memory_space<smem>>
    %11 = arith.index_cast %10 : i32 to index
    %c0_8 = arith.constant 0 : index
    %12 = vector.load %arg1[%11, %c0_8] : memref<30x128xf32, #tpu.memory_space<vmem>>, vector<1x128xf32>
    %c8 = arith.constant 8 : index
    %c0_9 = arith.constant 0 : index
    %13 = vector.load %arg8[%c8, %c0_9] : memref<64x128xf32, #tpu.memory_space<vmem>>, vector<1x128xf32>
    tpu.vector_store %arg8[%c8, %c0_9], %12 {strides = array<i32>} : memref<64x128xf32, #tpu.memory_space<vmem>>, vector<1x128xf32>,
    %c3 = arith.constant 3 : index
    %14 = memref.load %arg0[%c3] : memref<16xi32, #tpu.memory_space<smem>>
    %15 = arith.index_cast %14 : i32 to index
    %c0_10 = arith.constant 0 : index
    %16 = vector.load %arg1[%15, %c0_10] : memref<30x128xf32, #tpu.memory_space<vmem>>, vector<1x128xf32>
    %c9 = arith.constant 9 : index
    %c0_11 = arith.constant 0 : index
    %17 = vector.load %arg8[%c9, %c0_11] : memref<64x128xf32, #tpu.memory_space<vmem>>, vector<1x128xf32>
    tpu.vector_store %arg8[%c9, %c0_11], %16 {strides = array<i32>} : memref<64x128xf32, #tpu.memory_space<vmem>>, vector<1x128xf32>,
    %c4 = arith.constant 4 : index
    %18 = memref.load %arg0[%c4] : memref<16xi32, #tpu.memory_space<smem>>
    %19 = arith.index_cast %18 : i32 to index
    %c0_12 = arith.constant 0 : index
    %20 = vector.load %arg1[%19, %c0_12] : memref<30x128xf32, #tpu.memory_space<vmem>>, vector<1x128xf32>
    %c16 = arith.constant 16 : index
    %c0_13 = arith.constant 0 : index
    %21 = vector.load %arg8[%c16, %c0_13] : memref<64x128xf32, #tpu.memory_space<vmem>>, vector<1x128xf32>
    tpu.vector_store %arg8[%c16, %c0_13], %20 {strides = array<i32>} : memref<64x128xf32, #tpu.memory_space<vmem>>, vector<1x128xf32>,
    %c5 = arith.constant 5 : index
    %22 = memref.load %arg0[%c5] : memref<16xi32, #tpu.memory_space<smem>>
    %23 = arith.index_cast %22 : i32 to index
    %c0_14 = arith.constant 0 : index
    %24 = vector.load %arg1[%23, %c0_14] : memref<30x128xf32, #tpu.memory_space<vmem>>, vector<1x128xf32>
    %c17 = arith.constant 17 : index
    %c0_15 = arith.constant 0 : index
    %25 = vector.load %arg8[%c17, %c0_15] : memref<64x128xf32, #tpu.memory_space<vmem>>, vector<1x128xf32>
    tpu.vector_store %arg8[%c17, %c0_15], %24 {strides = array<i32>} : memref<64x128xf32, #tpu.memory_space<vmem>>, vector<1x128xf32>,
    %c6 = arith.constant 6 : index
    %26 = memref.load %arg0[%c6] : memref<16xi32, #tpu.memory_space<smem>>
    %27 = arith.index_cast %26 : i32 to index
    %c0_16 = arith.constant 0 : index
    %28 = vector.load %arg1[%27, %c0_16] : memref<30x128xf32, #tpu.memory_space<vmem>>, vector<1x128xf32>
    %c24 = arith.constant 24 : index
    %c0_17 = arith.constant 0 : index
    %29 = vector.load %arg8[%c24, %c0_17] : memref<64x128xf32, #tpu.memory_space<vmem>>, vector<1x128xf32>
    tpu.vector_store %arg8[%c24, %c0_17], %28 {strides = array<i32>} : memref<64x128xf32, #tpu.memory_space<vmem>>, vector<1x128xf32>,
    %c7 = arith.constant 7 : index
    %30 = memref.load %arg0[%c7] : memref<16xi32, #tpu.memory_space<smem>>
    %31 = arith.index_cast %30 : i32 to index
    %c0_18 = arith.constant 0 : index
    %32 = vector.load %arg1[%31, %c0_18] : memref<30x128xf32, #tpu.memory_space<vmem>>, vector<1x128xf32>
    %c25 = arith.constant 25 : index
    %c0_19 = arith.constant 0 : index
    %33 = vector.load %arg8[%c25, %c0_19] : memref<64x128xf32, #tpu.memory_space<vmem>>, vector<1x128xf32>
    tpu.vector_store %arg8[%c25, %c0_19], %32 {strides = array<i32>} : memref<64x128xf32, #tpu.memory_space<vmem>>, vector<1x128xf32>,
    %c8_20 = arith.constant 8 : index
    %34 = memref.load %arg0[%c8_20] : memref<16xi32, #tpu.memory_space<smem>>
    %35 = arith.index_cast %34 : i32 to index
    %c0_21 = arith.constant 0 : index
    %36 = vector.load %arg1[%35, %c0_21] : memref<30x128xf32, #tpu.memory_space<vmem>>, vector<1x128xf32>
    %c32 = arith.constant 32 : index
    %c0_22 = arith.constant 0 : index
    %37 = vector.load %arg8[%c32, %c0_22] : memref<64x128xf32, #tpu.memory_space<vmem>>, vector<1x128xf32>
    tpu.vector_store %arg8[%c32, %c0_22], %36 {strides = array<i32>} : memref<64x128xf32, #tpu.memory_space<vmem>>, vector<1x128xf32>,
    %c9_23 = arith.constant 9 : index
    %38 = memref.load %arg0[%c9_23] : memref<16xi32, #tpu.memory_space<smem>>
    %39 = arith.index_cast %38 : i32 to index
    %c0_24 = arith.constant 0 : index
    %40 = vector.load %arg1[%39, %c0_24] : memref<30x128xf32, #tpu.memory_space<vmem>>, vector<1x128xf32>
    %c33 = arith.constant 33 : index
    %c0_25 = arith.constant 0 : index
    %41 = vector.load %arg8[%c33, %c0_25] : memref<64x128xf32, #tpu.memory_space<vmem>>, vector<1x128xf32>
    tpu.vector_store %arg8[%c33, %c0_25], %40 {strides = array<i32>} : memref<64x128xf32, #tpu.memory_space<vmem>>, vector<1x128xf32>,
    %c10 = arith.constant 10 : index
    %42 = memref.load %arg0[%c10] : memref<16xi32, #tpu.memory_space<smem>>
    %43 = arith.index_cast %42 : i32 to index
    %c0_26 = arith.constant 0 : index
    %44 = vector.load %arg1[%43, %c0_26] : memref<30x128xf32, #tpu.memory_space<vmem>>, vector<1x128xf32>
    %c40 = arith.constant 40 : index
    %c0_27 = arith.constant 0 : index
    %45 = vector.load %arg8[%c40, %c0_27] : memref<64x128xf32, #tpu.memory_space<vmem>>, vector<1x128xf32>
    tpu.vector_store %arg8[%c40, %c0_27], %44 {strides = array<i32>} : memref<64x128xf32, #tpu.memory_space<vmem>>, vector<1x128xf32>,
    %c11 = arith.constant 11 : index
    %46 = memref.load %arg0[%c11] : memref<16xi32, #tpu.memory_space<smem>>
    %47 = arith.index_cast %46 : i32 to index
    %c0_28 = arith.constant 0 : index
    %48 = vector.load %arg1[%47, %c0_28] : memref<30x128xf32, #tpu.memory_space<vmem>>, vector<1x128xf32>
    %c41 = arith.constant 41 : index
    %c0_29 = arith.constant 0 : index
    %49 = vector.load %arg8[%c41, %c0_29] : memref<64x128xf32, #tpu.memory_space<vmem>>, vector<1x128xf32>
    tpu.vector_store %arg8[%c41, %c0_29], %48 {strides = array<i32>} : memref<64x128xf32, #tpu.memory_space<vmem>>, vector<1x128xf32>,
    %c12 = arith.constant 12 : index
    %50 = memref.load %arg0[%c12] : memref<16xi32, #tpu.memory_space<smem>>
    %51 = arith.index_cast %50 : i32 to index
    %c0_30 = arith.constant 0 : index
    %52 = vector.load %arg1[%51, %c0_30] : memref<30x128xf32, #tpu.memory_space<vmem>>, vector<1x128xf32>
    %c48 = arith.constant 48 : index
    %c0_31 = arith.constant 0 : index
    %53 = vector.load %arg8[%c48, %c0_31] : memref<64x128xf32, #tpu.memory_space<vmem>>, vector<1x128xf32>
    tpu.vector_store %arg8[%c48, %c0_31], %52 {strides = array<i32>} : memref<64x128xf32, #tpu.memory_space<vmem>>, vector<1x128xf32>,
    %c13 = arith.constant 13 : index
    %54 = memref.load %arg0[%c13] : memref<16xi32, #tpu.memory_space<smem>>
    %55 = arith.index_cast %54 : i32 to index
    %c0_32 = arith.constant 0 : index
    %56 = vector.load %arg1[%55, %c0_32] : memref<30x128xf32, #tpu.memory_space<vmem>>, vector<1x128xf32>
    %c49 = arith.constant 49 : index
    %c0_33 = arith.constant 0 : index
    %57 = vector.load %arg8[%c49, %c0_33] : memref<64x128xf32, #tpu.memory_space<vmem>>, vector<1x128xf32>
    tpu.vector_store %arg8[%c49, %c0_33], %56 {strides = array<i32>} : memref<64x128xf32, #tpu.memory_space<vmem>>, vector<1x128xf32>,
    %c14 = arith.constant 14 : index
    %58 = memref.load %arg0[%c14] : memref<16xi32, #tpu.memory_space<smem>>
    %59 = arith.index_cast %58 : i32 to index
    %c0_34 = arith.constant 0 : index
    %60 = vector.load %arg1[%59, %c0_34] : memref<30x128xf32, #tpu.memory_space<vmem>>, vector<1x128xf32>
    %c56 = arith.constant 56 : index
    %c0_35 = arith.constant 0 : index
    %61 = vector.load %arg8[%c56, %c0_35] : memref<64x128xf32, #tpu.memory_space<vmem>>, vector<1x128xf32>
    tpu.vector_store %arg8[%c56, %c0_35], %60 {strides = array<i32>} : memref<64x128xf32, #tpu.memory_space<vmem>>, vector<1x128xf32>,
    %c15 = arith.constant 15 : index
    %62 = memref.load %arg0[%c15] : memref<16xi32, #tpu.memory_space<smem>>
    %63 = arith.index_cast %62 : i32 to index
    %c0_36 = arith.constant 0 : index
    %64 = vector.load %arg1[%63, %c0_36] : memref<30x128xf32, #tpu.memory_space<vmem>>, vector<1x128xf32>
    %c57 = arith.constant 57 : index
    %c0_37 = arith.constant 0 : index
    %65 = vector.load %arg8[%c57, %c0_37] : memref<64x128xf32, #tpu.memory_space<vmem>>, vector<1x128xf32>
    tpu.vector_store %arg8[%c57, %c0_37], %64 {strides = array<i32>} : memref<64x128xf32, #tpu.memory_space<vmem>>, vector<1x128xf32>,
    %c0_38 = arith.constant 0 : index
    %c0_39 = arith.constant 0 : index
    %66 = vector.load %arg8[%c0_38, %c0_39] : memref<64x128xf32, #tpu.memory_space<vmem>>, vector<64x128xf32>
    %67 = arith.truncf %66 : vector<64x128xf32> to vector<64x128xbf16>
    %c0_40 = arith.constant 0 : index
    %c0_41 = arith.constant 0 : index
    %68 = vector.load %arg2[%c0_40, %c0_41] : memref<128x512xbf16, #tpu.memory_space<vmem>>, vector<128x512xbf16>
    %cst_42 = arith.constant dense<0.000000e+00> : vector<64x512xf32>
    %69 = tpu.matmul %67, %68, %cst_42 {dimension_numbers = #tpu.dot_dimension_numbers<[1], [0], [0], [1], [0, 0, 1, 1], [], []>} : vector<64x128xbf16>, vector<128x512xbf16>, vector<64x512xf32> -> vector<64x512xf32>
    %c0_43 = arith.constant 0 : index
    %c0_44 = arith.constant 0 : index
    %70 = vector.load %arg4[%c0_43, %c0_44] : memref<1x512xf32, #tpu.memory_space<vmem>>, vector<1x512xf32>
    %71 = vector.broadcast %70 : vector<1x512xf32> to vector<64x512xf32>
    %72 = arith.addf %69, %71 : vector<64x512xf32>
    %c0_45 = arith.constant 0 : index
    %c0_46 = arith.constant 0 : index
    %73 = vector.load %arg9[%c0_45, %c0_46] : memref<64x512xf32, #tpu.memory_space<vmem>>, vector<64x512xf32>
    tpu.vector_store %arg9[%c0_45, %c0_46], %72 {strides = array<i32>} : memref<64x512xf32, #tpu.memory_space<vmem>>, vector<64x512xf32>,
    %cst_47 = arith.constant 0.000000e+00 : bf16
    %74 = vector.broadcast %cst_47 : bf16 to vector<8x128xbf16>
    %cst_48 = arith.constant 0.000000e+00 : f32
    %75 = vector.broadcast %cst_48 : f32 to vector<8x128xf32>
    %c0_49 = arith.constant 0 : index
    %c0_50 = arith.constant 0 : index
    %76 = vector.load %arg9[%c0_49, %c0_50] : memref<64x512xf32, #tpu.memory_space<vmem>>, vector<8x512xf32>
    %c0_51 = arith.constant 0 : index
    %c0_52 = arith.constant 0 : index
    %77 = vector.load %arg3[%c0_51, %c0_52] : memref<128x512xbf16, #tpu.memory_space<vmem>>, vector<128x512xbf16>
    %cst_53 = arith.constant dense<0.000000e+00> : vector<8x512xf32>
    %78 = tpu.matmul %74, %77, %cst_53 {dimension_numbers = #tpu.dot_dimension_numbers<[1], [0], [0], [1], [0, 0, 1, 1], [], []>} : vector<8x128xbf16>, vector<128x512xbf16>, vector<8x512xf32> -> vector<8x512xf32>
    %79 = arith.addf %76, %78 : vector<8x512xf32>
    %80 = vector.extract_strided_slice %79 {offsets = [0, 0], sizes = [8, 128], strides = [1, 1]} : vector<8x512xf32> to vector<8x128xf32>
    %cst_54 = arith.constant 5.000000e-01 : f32
    %81 = vector.broadcast %cst_54 : f32 to vector<8x128xf32>
    %82 = arith.mulf %81, %80 : vector<8x128xf32>
    %83 = math.tanh %82 : vector<8x128xf32>
    %cst_55 = arith.constant 5.000000e-01 : f32
    %84 = vector.broadcast %cst_55 : f32 to vector<8x128xf32>
    %85 = arith.mulf %84, %83 : vector<8x128xf32>
    %cst_56 = arith.constant 5.000000e-01 : f32
    %86 = vector.broadcast %cst_56 : f32 to vector<8x128xf32>
    %87 = arith.addf %85, %86 : vector<8x128xf32>
    %88 = vector.extract_strided_slice %79 {offsets = [0, 128], sizes = [8, 128], strides = [1, 1]} : vector<8x512xf32> to vector<8x128xf32>
    %cst_57 = arith.constant 5.000000e-01 : f32
    %89 = vector.broadcast %cst_57 : f32 to vector<8x128xf32>
    %90 = arith.mulf %89, %88 : vector<8x128xf32>
    %91 = math.tanh %90 : vector<8x128xf32>
    %cst_58 = arith.constant 5.000000e-01 : f32
    %92 = vector.broadcast %cst_58 : f32 to vector<8x128xf32>
    %93 = arith.mulf %92, %91 : vector<8x128xf32>
    %cst_59 = arith.constant 5.000000e-01 : f32
    %94 = vector.broadcast %cst_59 : f32 to vector<8x128xf32>
    %95 = arith.addf %93, %94 : vector<8x128xf32>
    %96 = vector.extract_strided_slice %79 {offsets = [0, 256], sizes = [8, 128], strides = [1, 1]} : vector<8x512xf32> to vector<8x128xf32>
    %97 = math.tanh %96 : vector<8x128xf32>
    %98 = vector.extract_strided_slice %79 {offsets = [0, 384], sizes = [8, 128], strides = [1, 1]} : vector<8x512xf32> to vector<8x128xf32>
    %cst_60 = arith.constant 5.000000e-01 : f32
    %99 = vector.broadcast %cst_60 : f32 to vector<8x128xf32>
    %100 = arith.mulf %99, %98 : vector<8x128xf32>
    %101 = math.tanh %100 : vector<8x128xf32>
    %cst_61 = arith.constant 5.000000e-01 : f32
    %102 = vector.broadcast %cst_61 : f32 to vector<8x128xf32>
    %103 = arith.mulf %102, %101 : vector<8x128xf32>
    %cst_62 = arith.constant 5.000000e-01 : f32
    %104 = vector.broadcast %cst_62 : f32 to vector<8x128xf32>
    %105 = arith.addf %103, %104 : vector<8x128xf32>
    %106 = arith.mulf %95, %75 : vector<8x128xf32>
    %107 = arith.mulf %87, %97 : vector<8x128xf32>
    %108 = arith.addf %106, %107 : vector<8x128xf32>
    %109 = math.tanh %108 : vector<8x128xf32>
    %110 = arith.mulf %105, %109 : vector<8x128xf32>
    %111 = arith.truncf %110 : vector<8x128xf32> to vector<8x128xbf16>
    %c0_63 = arith.constant 0 : index
    %c0_64 = arith.constant 0 : index
    %112 = vector.load %arg10[%c0_63, %c0_64] : memref<64x128xbf16, #tpu.memory_space<vmem>>, vector<8x128xbf16>
    tpu.vector_store %arg10[%c0_63, %c0_64], %111 {strides = array<i32>} : memref<64x128xbf16, #tpu.memory_space<vmem>>, vector<8x128xbf16>,
    %c8_65 = arith.constant 8 : index
    %c0_66 = arith.constant 0 : index
    %113 = vector.load %arg9[%c8_65, %c0_66] : memref<64x512xf32, #tpu.memory_space<vmem>>, vector<8x512xf32>
    %c0_67 = arith.constant 0 : index
    %c0_68 = arith.constant 0 : index
    %114 = vector.load %arg3[%c0_67, %c0_68] : memref<128x512xbf16, #tpu.memory_space<vmem>>, vector<128x512xbf16>
    %cst_69 = arith.constant dense<0.000000e+00> : vector<8x512xf32>
    %115 = tpu.matmul %111, %114, %cst_69 {dimension_numbers = #tpu.dot_dimension_numbers<[1], [0], [0], [1], [0, 0, 1, 1], [], []>} : vector<8x128xbf16>, vector<128x512xbf16>, vector<8x512xf32> -> vector<8x512xf32>
    %116 = arith.addf %113, %115 : vector<8x512xf32>
    %117 = vector.extract_strided_slice %116 {offsets = [0, 0], sizes = [8, 128], strides = [1, 1]} : vector<8x512xf32> to vector<8x128xf32>
    %cst_70 = arith.constant 5.000000e-01 : f32
    %118 = vector.broadcast %cst_70 : f32 to vector<8x128xf32>
    %119 = arith.mulf %118, %117 : vector<8x128xf32>
    %120 = math.tanh %119 : vector<8x128xf32>
    %cst_71 = arith.constant 5.000000e-01 : f32
    %121 = vector.broadcast %cst_71 : f32 to vector<8x128xf32>
    %122 = arith.mulf %121, %120 : vector<8x128xf32>
    %cst_72 = arith.constant 5.000000e-01 : f32
    %123 = vector.broadcast %cst_72 : f32 to vector<8x128xf32>
    %124 = arith.addf %122, %123 : vector<8x128xf32>
    %125 = vector.extract_strided_slice %116 {offsets = [0, 128], sizes = [8, 128], strides = [1, 1]} : vector<8x512xf32> to vector<8x128xf32>
    %cst_73 = arith.constant 5.000000e-01 : f32
    %126 = vector.broadcast %cst_73 : f32 to vector<8x128xf32>
    %127 = arith.mulf %126, %125 : vector<8x128xf32>
    %128 = math.tanh %127 : vector<8x128xf32>
    %cst_74 = arith.constant 5.000000e-01 : f32
    %129 = vector.broadcast %cst_74 : f32 to vector<8x128xf32>
    %130 = arith.mulf %129, %128 : vector<8x128xf32>
    %cst_75 = arith.constant 5.000000e-01 : f32
    %131 = vector.broadcast %cst_75 : f32 to vector<8x128xf32>
    %132 = arith.addf %130, %131 : vector<8x128xf32>
    %133 = vector.extract_strided_slice %116 {offsets = [0, 256], sizes = [8, 128], strides = [1, 1]} : vector<8x512xf32> to vector<8x128xf32>
    %134 = math.tanh %133 : vector<8x128xf32>
    %135 = vector.extract_strided_slice %116 {offsets = [0, 384], sizes = [8, 128], strides = [1, 1]} : vector<8x512xf32> to vector<8x128xf32>
    %cst_76 = arith.constant 5.000000e-01 : f32
    %136 = vector.broadcast %cst_76 : f32 to vector<8x128xf32>
    %137 = arith.mulf %136, %135 : vector<8x128xf32>
    %138 = math.tanh %137 : vector<8x128xf32>
    %cst_77 = arith.constant 5.000000e-01 : f32
    %139 = vector.broadcast %cst_77 : f32 to vector<8x128xf32>
    %140 = arith.mulf %139, %138 : vector<8x128xf32>
    %cst_78 = arith.constant 5.000000e-01 : f32
    %141 = vector.broadcast %cst_78 : f32 to vector<8x128xf32>
    %142 = arith.addf %140, %141 : vector<8x128xf32>
    %143 = arith.mulf %132, %108 : vector<8x128xf32>
    %144 = arith.mulf %124, %134 : vector<8x128xf32>
    %145 = arith.addf %143, %144 : vector<8x128xf32>
    %146 = math.tanh %145 : vector<8x128xf32>
    %147 = arith.mulf %142, %146 : vector<8x128xf32>
    %148 = arith.truncf %147 : vector<8x128xf32> to vector<8x128xbf16>
    %c8_79 = arith.constant 8 : index
    %c0_80 = arith.constant 0 : index
    %149 = vector.load %arg10[%c8_79, %c0_80] : memref<64x128xbf16, #tpu.memory_space<vmem>>, vector<8x128xbf16>
    tpu.vector_store %arg10[%c8_79, %c0_80], %148 {strides = array<i32>} : memref<64x128xbf16, #tpu.memory_space<vmem>>, vector<8x128xbf16>,
    %c16_81 = arith.constant 16 : index
    %c0_82 = arith.constant 0 : index
    %150 = vector.load %arg9[%c16_81, %c0_82] : memref<64x512xf32, #tpu.memory_space<vmem>>, vector<8x512xf32>
    %c0_83 = arith.constant 0 : index
    %c0_84 = arith.constant 0 : index
    %151 = vector.load %arg3[%c0_83, %c0_84] : memref<128x512xbf16, #tpu.memory_space<vmem>>, vector<128x512xbf16>
    %cst_85 = arith.constant dense<0.000000e+00> : vector<8x512xf32>
    %152 = tpu.matmul %148, %151, %cst_85 {dimension_numbers = #tpu.dot_dimension_numbers<[1], [0], [0], [1], [0, 0, 1, 1], [], []>} : vector<8x128xbf16>, vector<128x512xbf16>, vector<8x512xf32> -> vector<8x512xf32>
    %153 = arith.addf %150, %152 : vector<8x512xf32>
    %154 = vector.extract_strided_slice %153 {offsets = [0, 0], sizes = [8, 128], strides = [1, 1]} : vector<8x512xf32> to vector<8x128xf32>
    %cst_86 = arith.constant 5.000000e-01 : f32
    %155 = vector.broadcast %cst_86 : f32 to vector<8x128xf32>
    %156 = arith.mulf %155, %154 : vector<8x128xf32>
    %157 = math.tanh %156 : vector<8x128xf32>
    %cst_87 = arith.constant 5.000000e-01 : f32
    %158 = vector.broadcast %cst_87 : f32 to vector<8x128xf32>
    %159 = arith.mulf %158, %157 : vector<8x128xf32>
    %cst_88 = arith.constant 5.000000e-01 : f32
    %160 = vector.broadcast %cst_88 : f32 to vector<8x128xf32>
    %161 = arith.addf %159, %160 : vector<8x128xf32>
    %162 = vector.extract_strided_slice %153 {offsets = [0, 128], sizes = [8, 128], strides = [1, 1]} : vector<8x512xf32> to vector<8x128xf32>
    %cst_89 = arith.constant 5.000000e-01 : f32
    %163 = vector.broadcast %cst_89 : f32 to vector<8x128xf32>
    %164 = arith.mulf %163, %162 : vector<8x128xf32>
    %165 = math.tanh %164 : vector<8x128xf32>
    %cst_90 = arith.constant 5.000000e-01 : f32
    %166 = vector.broadcast %cst_90 : f32 to vector<8x128xf32>
    %167 = arith.mulf %166, %165 : vector<8x128xf32>
    %cst_91 = arith.constant 5.000000e-01 : f32
    %168 = vector.broadcast %cst_91 : f32 to vector<8x128xf32>
    %169 = arith.addf %167, %168 : vector<8x128xf32>
    %170 = vector.extract_strided_slice %153 {offsets = [0, 256], sizes = [8, 128], strides = [1, 1]} : vector<8x512xf32> to vector<8x128xf32>
    %171 = math.tanh %170 : vector<8x128xf32>
    %172 = vector.extract_strided_slice %153 {offsets = [0, 384], sizes = [8, 128], strides = [1, 1]} : vector<8x512xf32> to vector<8x128xf32>
    %cst_92 = arith.constant 5.000000e-01 : f32
    %173 = vector.broadcast %cst_92 : f32 to vector<8x128xf32>
    %174 = arith.mulf %173, %172 : vector<8x128xf32>
    %175 = math.tanh %174 : vector<8x128xf32>
    %cst_93 = arith.constant 5.000000e-01 : f32
    %176 = vector.broadcast %cst_93 : f32 to vector<8x128xf32>
    %177 = arith.mulf %176, %175 : vector<8x128xf32>
    %cst_94 = arith.constant 5.000000e-01 : f32
    %178 = vector.broadcast %cst_94 : f32 to vector<8x128xf32>
    %179 = arith.addf %177, %178 : vector<8x128xf32>
    %180 = arith.mulf %169, %145 : vector<8x128xf32>
    %181 = arith.mulf %161, %171 : vector<8x128xf32>
    %182 = arith.addf %180, %181 : vector<8x128xf32>
    %183 = math.tanh %182 : vector<8x128xf32>
    %184 = arith.mulf %179, %183 : vector<8x128xf32>
    %185 = arith.truncf %184 : vector<8x128xf32> to vector<8x128xbf16>
    %c16_95 = arith.constant 16 : index
    %c0_96 = arith.constant 0 : index
    %186 = vector.load %arg10[%c16_95, %c0_96] : memref<64x128xbf16, #tpu.memory_space<vmem>>, vector<8x128xbf16>
    tpu.vector_store %arg10[%c16_95, %c0_96], %185 {strides = array<i32>} : memref<64x128xbf16, #tpu.memory_space<vmem>>, vector<8x128xbf16>,
    %c24_97 = arith.constant 24 : index
    %c0_98 = arith.constant 0 : index
    %187 = vector.load %arg9[%c24_97, %c0_98] : memref<64x512xf32, #tpu.memory_space<vmem>>, vector<8x512xf32>
    %c0_99 = arith.constant 0 : index
    %c0_100 = arith.constant 0 : index
    %188 = vector.load %arg3[%c0_99, %c0_100] : memref<128x512xbf16, #tpu.memory_space<vmem>>, vector<128x512xbf16>
    %cst_101 = arith.constant dense<0.000000e+00> : vector<8x512xf32>
    %189 = tpu.matmul %185, %188, %cst_101 {dimension_numbers = #tpu.dot_dimension_numbers<[1], [0], [0], [1], [0, 0, 1, 1], [], []>} : vector<8x128xbf16>, vector<128x512xbf16>, vector<8x512xf32> -> vector<8x512xf32>
    %190 = arith.addf %187, %189 : vector<8x512xf32>
    %191 = vector.extract_strided_slice %190 {offsets = [0, 0], sizes = [8, 128], strides = [1, 1]} : vector<8x512xf32> to vector<8x128xf32>
    %cst_102 = arith.constant 5.000000e-01 : f32
    %192 = vector.broadcast %cst_102 : f32 to vector<8x128xf32>
    %193 = arith.mulf %192, %191 : vector<8x128xf32>
    %194 = math.tanh %193 : vector<8x128xf32>
    %cst_103 = arith.constant 5.000000e-01 : f32
    %195 = vector.broadcast %cst_103 : f32 to vector<8x128xf32>
    %196 = arith.mulf %195, %194 : vector<8x128xf32>
    %cst_104 = arith.constant 5.000000e-01 : f32
    %197 = vector.broadcast %cst_104 : f32 to vector<8x128xf32>
    %198 = arith.addf %196, %197 : vector<8x128xf32>
    %199 = vector.extract_strided_slice %190 {offsets = [0, 128], sizes = [8, 128], strides = [1, 1]} : vector<8x512xf32> to vector<8x128xf32>
    %cst_105 = arith.constant 5.000000e-01 : f32
    %200 = vector.broadcast %cst_105 : f32 to vector<8x128xf32>
    %201 = arith.mulf %200, %199 : vector<8x128xf32>
    %202 = math.tanh %201 : vector<8x128xf32>
    %cst_106 = arith.constant 5.000000e-01 : f32
    %203 = vector.broadcast %cst_106 : f32 to vector<8x128xf32>
    %204 = arith.mulf %203, %202 : vector<8x128xf32>
    %cst_107 = arith.constant 5.000000e-01 : f32
    %205 = vector.broadcast %cst_107 : f32 to vector<8x128xf32>
    %206 = arith.addf %204, %205 : vector<8x128xf32>
    %207 = vector.extract_strided_slice %190 {offsets = [0, 256], sizes = [8, 128], strides = [1, 1]} : vector<8x512xf32> to vector<8x128xf32>
    %208 = math.tanh %207 : vector<8x128xf32>
    %209 = vector.extract_strided_slice %190 {offsets = [0, 384], sizes = [8, 128], strides = [1, 1]} : vector<8x512xf32> to vector<8x128xf32>
    %cst_108 = arith.constant 5.000000e-01 : f32
    %210 = vector.broadcast %cst_108 : f32 to vector<8x128xf32>
    %211 = arith.mulf %210, %209 : vector<8x128xf32>
    %212 = math.tanh %211 : vector<8x128xf32>
    %cst_109 = arith.constant 5.000000e-01 : f32
    %213 = vector.broadcast %cst_109 : f32 to vector<8x128xf32>
    %214 = arith.mulf %213, %212 : vector<8x128xf32>
    %cst_110 = arith.constant 5.000000e-01 : f32
    %215 = vector.broadcast %cst_110 : f32 to vector<8x128xf32>
    %216 = arith.addf %214, %215 : vector<8x128xf32>
    %217 = arith.mulf %206, %182 : vector<8x128xf32>
    %218 = arith.mulf %198, %208 : vector<8x128xf32>
    %219 = arith.addf %217, %218 : vector<8x128xf32>
    %220 = math.tanh %219 : vector<8x128xf32>
    %221 = arith.mulf %216, %220 : vector<8x128xf32>
    %222 = arith.truncf %221 : vector<8x128xf32> to vector<8x128xbf16>
    %c24_111 = arith.constant 24 : index
    %c0_112 = arith.constant 0 : index
    %223 = vector.load %arg10[%c24_111, %c0_112] : memref<64x128xbf16, #tpu.memory_space<vmem>>, vector<8x128xbf16>
    tpu.vector_store %arg10[%c24_111, %c0_112], %222 {strides = array<i32>} : memref<64x128xbf16, #tpu.memory_space<vmem>>, vector<8x128xbf16>,
    %c32_113 = arith.constant 32 : index
    %c0_114 = arith.constant 0 : index
    %224 = vector.load %arg9[%c32_113, %c0_114] : memref<64x512xf32, #tpu.memory_space<vmem>>, vector<8x512xf32>
    %c0_115 = arith.constant 0 : index
    %c0_116 = arith.constant 0 : index
    %225 = vector.load %arg3[%c0_115, %c0_116] : memref<128x512xbf16, #tpu.memory_space<vmem>>, vector<128x512xbf16>
    %cst_117 = arith.constant dense<0.000000e+00> : vector<8x512xf32>
    %226 = tpu.matmul %222, %225, %cst_117 {dimension_numbers = #tpu.dot_dimension_numbers<[1], [0], [0], [1], [0, 0, 1, 1], [], []>} : vector<8x128xbf16>, vector<128x512xbf16>, vector<8x512xf32> -> vector<8x512xf32>
    %227 = arith.addf %224, %226 : vector<8x512xf32>
    %228 = vector.extract_strided_slice %227 {offsets = [0, 0], sizes = [8, 128], strides = [1, 1]} : vector<8x512xf32> to vector<8x128xf32>
    %cst_118 = arith.constant 5.000000e-01 : f32
    %229 = vector.broadcast %cst_118 : f32 to vector<8x128xf32>
    %230 = arith.mulf %229, %228 : vector<8x128xf32>
    %231 = math.tanh %230 : vector<8x128xf32>
    %cst_119 = arith.constant 5.000000e-01 : f32
    %232 = vector.broadcast %cst_119 : f32 to vector<8x128xf32>
    %233 = arith.mulf %232, %231 : vector<8x128xf32>
    %cst_120 = arith.constant 5.000000e-01 : f32
    %234 = vector.broadcast %cst_120 : f32 to vector<8x128xf32>
    %235 = arith.addf %233, %234 : vector<8x128xf32>
    %236 = vector.extract_strided_slice %227 {offsets = [0, 128], sizes = [8, 128], strides = [1, 1]} : vector<8x512xf32> to vector<8x128xf32>
    %cst_121 = arith.constant 5.000000e-01 : f32
    %237 = vector.broadcast %cst_121 : f32 to vector<8x128xf32>
    %238 = arith.mulf %237, %236 : vector<8x128xf32>
    %239 = math.tanh %238 : vector<8x128xf32>
    %cst_122 = arith.constant 5.000000e-01 : f32
    %240 = vector.broadcast %cst_122 : f32 to vector<8x128xf32>
    %241 = arith.mulf %240, %239 : vector<8x128xf32>
    %cst_123 = arith.constant 5.000000e-01 : f32
    %242 = vector.broadcast %cst_123 : f32 to vector<8x128xf32>
    %243 = arith.addf %241, %242 : vector<8x128xf32>
    %244 = vector.extract_strided_slice %227 {offsets = [0, 256], sizes = [8, 128], strides = [1, 1]} : vector<8x512xf32> to vector<8x128xf32>
    %245 = math.tanh %244 : vector<8x128xf32>
    %246 = vector.extract_strided_slice %227 {offsets = [0, 384], sizes = [8, 128], strides = [1, 1]} : vector<8x512xf32> to vector<8x128xf32>
    %cst_124 = arith.constant 5.000000e-01 : f32
    %247 = vector.broadcast %cst_124 : f32 to vector<8x128xf32>
    %248 = arith.mulf %247, %246 : vector<8x128xf32>
    %249 = math.tanh %248 : vector<8x128xf32>
    %cst_125 = arith.constant 5.000000e-01 : f32
    %250 = vector.broadcast %cst_125 : f32 to vector<8x128xf32>
    %251 = arith.mulf %250, %249 : vector<8x128xf32>
    %cst_126 = arith.constant 5.000000e-01 : f32
    %252 = vector.broadcast %cst_126 : f32 to vector<8x128xf32>
    %253 = arith.addf %251, %252 : vector<8x128xf32>
    %254 = arith.mulf %243, %219 : vector<8x128xf32>
    %255 = arith.mulf %235, %245 : vector<8x128xf32>
    %256 = arith.addf %254, %255 : vector<8x128xf32>
    %257 = math.tanh %256 : vector<8x128xf32>
    %258 = arith.mulf %253, %257 : vector<8x128xf32>
    %259 = arith.truncf %258 : vector<8x128xf32> to vector<8x128xbf16>
    %c32_127 = arith.constant 32 : index
    %c0_128 = arith.constant 0 : index
    %260 = vector.load %arg10[%c32_127, %c0_128] : memref<64x128xbf16, #tpu.memory_space<vmem>>, vector<8x128xbf16>
    tpu.vector_store %arg10[%c32_127, %c0_128], %259 {strides = array<i32>} : memref<64x128xbf16, #tpu.memory_space<vmem>>, vector<8x128xbf16>,
    %c40_129 = arith.constant 40 : index
    %c0_130 = arith.constant 0 : index
    %261 = vector.load %arg9[%c40_129, %c0_130] : memref<64x512xf32, #tpu.memory_space<vmem>>, vector<8x512xf32>
    %c0_131 = arith.constant 0 : index
    %c0_132 = arith.constant 0 : index
    %262 = vector.load %arg3[%c0_131, %c0_132] : memref<128x512xbf16, #tpu.memory_space<vmem>>, vector<128x512xbf16>
    %cst_133 = arith.constant dense<0.000000e+00> : vector<8x512xf32>
    %263 = tpu.matmul %259, %262, %cst_133 {dimension_numbers = #tpu.dot_dimension_numbers<[1], [0], [0], [1], [0, 0, 1, 1], [], []>} : vector<8x128xbf16>, vector<128x512xbf16>, vector<8x512xf32> -> vector<8x512xf32>
    %264 = arith.addf %261, %263 : vector<8x512xf32>
    %265 = vector.extract_strided_slice %264 {offsets = [0, 0], sizes = [8, 128], strides = [1, 1]} : vector<8x512xf32> to vector<8x128xf32>
    %cst_134 = arith.constant 5.000000e-01 : f32
    %266 = vector.broadcast %cst_134 : f32 to vector<8x128xf32>
    %267 = arith.mulf %266, %265 : vector<8x128xf32>
    %268 = math.tanh %267 : vector<8x128xf32>
    %cst_135 = arith.constant 5.000000e-01 : f32
    %269 = vector.broadcast %cst_135 : f32 to vector<8x128xf32>
    %270 = arith.mulf %269, %268 : vector<8x128xf32>
    %cst_136 = arith.constant 5.000000e-01 : f32
    %271 = vector.broadcast %cst_136 : f32 to vector<8x128xf32>
    %272 = arith.addf %270, %271 : vector<8x128xf32>
    %273 = vector.extract_strided_slice %264 {offsets = [0, 128], sizes = [8, 128], strides = [1, 1]} : vector<8x512xf32> to vector<8x128xf32>
    %cst_137 = arith.constant 5.000000e-01 : f32
    %274 = vector.broadcast %cst_137 : f32 to vector<8x128xf32>
    %275 = arith.mulf %274, %273 : vector<8x128xf32>
    %276 = math.tanh %275 : vector<8x128xf32>
    %cst_138 = arith.constant 5.000000e-01 : f32
    %277 = vector.broadcast %cst_138 : f32 to vector<8x128xf32>
    %278 = arith.mulf %277, %276 : vector<8x128xf32>
    %cst_139 = arith.constant 5.000000e-01 : f32
    %279 = vector.broadcast %cst_139 : f32 to vector<8x128xf32>
    %280 = arith.addf %278, %279 : vector<8x128xf32>
    %281 = vector.extract_strided_slice %264 {offsets = [0, 256], sizes = [8, 128], strides = [1, 1]} : vector<8x512xf32> to vector<8x128xf32>
    %282 = math.tanh %281 : vector<8x128xf32>
    %283 = vector.extract_strided_slice %264 {offsets = [0, 384], sizes = [8, 128], strides = [1, 1]} : vector<8x512xf32> to vector<8x128xf32>
    %cst_140 = arith.constant 5.000000e-01 : f32
    %284 = vector.broadcast %cst_140 : f32 to vector<8x128xf32>
    %285 = arith.mulf %284, %283 : vector<8x128xf32>
    %286 = math.tanh %285 : vector<8x128xf32>
    %cst_141 = arith.constant 5.000000e-01 : f32
    %287 = vector.broadcast %cst_141 : f32 to vector<8x128xf32>
    %288 = arith.mulf %287, %286 : vector<8x128xf32>
    %cst_142 = arith.constant 5.000000e-01 : f32
    %289 = vector.broadcast %cst_142 : f32 to vector<8x128xf32>
    %290 = arith.addf %288, %289 : vector<8x128xf32>
    %291 = arith.mulf %280, %256 : vector<8x128xf32>
    %292 = arith.mulf %272, %282 : vector<8x128xf32>
    %293 = arith.addf %291, %292 : vector<8x128xf32>
    %294 = math.tanh %293 : vector<8x128xf32>
    %295 = arith.mulf %290, %294 : vector<8x128xf32>
    %296 = arith.truncf %295 : vector<8x128xf32> to vector<8x128xbf16>
    %c40_143 = arith.constant 40 : index
    %c0_144 = arith.constant 0 : index
    %297 = vector.load %arg10[%c40_143, %c0_144] : memref<64x128xbf16, #tpu.memory_space<vmem>>, vector<8x128xbf16>
    tpu.vector_store %arg10[%c40_143, %c0_144], %296 {strides = array<i32>} : memref<64x128xbf16, #tpu.memory_space<vmem>>, vector<8x128xbf16>,
    %c48_145 = arith.constant 48 : index
    %c0_146 = arith.constant 0 : index
    %298 = vector.load %arg9[%c48_145, %c0_146] : memref<64x512xf32, #tpu.memory_space<vmem>>, vector<8x512xf32>
    %c0_147 = arith.constant 0 : index
    %c0_148 = arith.constant 0 : index
    %299 = vector.load %arg3[%c0_147, %c0_148] : memref<128x512xbf16, #tpu.memory_space<vmem>>, vector<128x512xbf16>
    %cst_149 = arith.constant dense<0.000000e+00> : vector<8x512xf32>
    %300 = tpu.matmul %296, %299, %cst_149 {dimension_numbers = #tpu.dot_dimension_numbers<[1], [0], [0], [1], [0, 0, 1, 1], [], []>} : vector<8x128xbf16>, vector<128x512xbf16>, vector<8x512xf32> -> vector<8x512xf32>
    %301 = arith.addf %298, %300 : vector<8x512xf32>
    %302 = vector.extract_strided_slice %301 {offsets = [0, 0], sizes = [8, 128], strides = [1, 1]} : vector<8x512xf32> to vector<8x128xf32>
    %cst_150 = arith.constant 5.000000e-01 : f32
    %303 = vector.broadcast %cst_150 : f32 to vector<8x128xf32>
    %304 = arith.mulf %303, %302 : vector<8x128xf32>
    %305 = math.tanh %304 : vector<8x128xf32>
    %cst_151 = arith.constant 5.000000e-01 : f32
    %306 = vector.broadcast %cst_151 : f32 to vector<8x128xf32>
    %307 = arith.mulf %306, %305 : vector<8x128xf32>
    %cst_152 = arith.constant 5.000000e-01 : f32
    %308 = vector.broadcast %cst_152 : f32 to vector<8x128xf32>
    %309 = arith.addf %307, %308 : vector<8x128xf32>
    %310 = vector.extract_strided_slice %301 {offsets = [0, 128], sizes = [8, 128], strides = [1, 1]} : vector<8x512xf32> to vector<8x128xf32>
    %cst_153 = arith.constant 5.000000e-01 : f32
    %311 = vector.broadcast %cst_153 : f32 to vector<8x128xf32>
    %312 = arith.mulf %311, %310 : vector<8x128xf32>
    %313 = math.tanh %312 : vector<8x128xf32>
    %cst_154 = arith.constant 5.000000e-01 : f32
    %314 = vector.broadcast %cst_154 : f32 to vector<8x128xf32>
    %315 = arith.mulf %314, %313 : vector<8x128xf32>
    %cst_155 = arith.constant 5.000000e-01 : f32
    %316 = vector.broadcast %cst_155 : f32 to vector<8x128xf32>
    %317 = arith.addf %315, %316 : vector<8x128xf32>
    %318 = vector.extract_strided_slice %301 {offsets = [0, 256], sizes = [8, 128], strides = [1, 1]} : vector<8x512xf32> to vector<8x128xf32>
    %319 = math.tanh %318 : vector<8x128xf32>
    %320 = vector.extract_strided_slice %301 {offsets = [0, 384], sizes = [8, 128], strides = [1, 1]} : vector<8x512xf32> to vector<8x128xf32>
    %cst_156 = arith.constant 5.000000e-01 : f32
    %321 = vector.broadcast %cst_156 : f32 to vector<8x128xf32>
    %322 = arith.mulf %321, %320 : vector<8x128xf32>
    %323 = math.tanh %322 : vector<8x128xf32>
    %cst_157 = arith.constant 5.000000e-01 : f32
    %324 = vector.broadcast %cst_157 : f32 to vector<8x128xf32>
    %325 = arith.mulf %324, %323 : vector<8x128xf32>
    %cst_158 = arith.constant 5.000000e-01 : f32
    %326 = vector.broadcast %cst_158 : f32 to vector<8x128xf32>
    %327 = arith.addf %325, %326 : vector<8x128xf32>
    %328 = arith.mulf %317, %293 : vector<8x128xf32>
    %329 = arith.mulf %309, %319 : vector<8x128xf32>
    %330 = arith.addf %328, %329 : vector<8x128xf32>
    %331 = math.tanh %330 : vector<8x128xf32>
    %332 = arith.mulf %327, %331 : vector<8x128xf32>
    %333 = arith.truncf %332 : vector<8x128xf32> to vector<8x128xbf16>
    %c48_159 = arith.constant 48 : index
    %c0_160 = arith.constant 0 : index
    %334 = vector.load %arg10[%c48_159, %c0_160] : memref<64x128xbf16, #tpu.memory_space<vmem>>, vector<8x128xbf16>
    tpu.vector_store %arg10[%c48_159, %c0_160], %333 {strides = array<i32>} : memref<64x128xbf16, #tpu.memory_space<vmem>>, vector<8x128xbf16>,
    %c56_161 = arith.constant 56 : index
    %c0_162 = arith.constant 0 : index
    %335 = vector.load %arg9[%c56_161, %c0_162] : memref<64x512xf32, #tpu.memory_space<vmem>>, vector<8x512xf32>
    %c0_163 = arith.constant 0 : index
    %c0_164 = arith.constant 0 : index
    %336 = vector.load %arg3[%c0_163, %c0_164] : memref<128x512xbf16, #tpu.memory_space<vmem>>, vector<128x512xbf16>
    %cst_165 = arith.constant dense<0.000000e+00> : vector<8x512xf32>
    %337 = tpu.matmul %333, %336, %cst_165 {dimension_numbers = #tpu.dot_dimension_numbers<[1], [0], [0], [1], [0, 0, 1, 1], [], []>} : vector<8x128xbf16>, vector<128x512xbf16>, vector<8x512xf32> -> vector<8x512xf32>
    %338 = arith.addf %335, %337 : vector<8x512xf32>
    %339 = vector.extract_strided_slice %338 {offsets = [0, 0], sizes = [8, 128], strides = [1, 1]} : vector<8x512xf32> to vector<8x128xf32>
    %cst_166 = arith.constant 5.000000e-01 : f32
    %340 = vector.broadcast %cst_166 : f32 to vector<8x128xf32>
    %341 = arith.mulf %340, %339 : vector<8x128xf32>
    %342 = math.tanh %341 : vector<8x128xf32>
    %cst_167 = arith.constant 5.000000e-01 : f32
    %343 = vector.broadcast %cst_167 : f32 to vector<8x128xf32>
    %344 = arith.mulf %343, %342 : vector<8x128xf32>
    %cst_168 = arith.constant 5.000000e-01 : f32
    %345 = vector.broadcast %cst_168 : f32 to vector<8x128xf32>
    %346 = arith.addf %344, %345 : vector<8x128xf32>
    %347 = vector.extract_strided_slice %338 {offsets = [0, 128], sizes = [8, 128], strides = [1, 1]} : vector<8x512xf32> to vector<8x128xf32>
    %cst_169 = arith.constant 5.000000e-01 : f32
    %348 = vector.broadcast %cst_169 : f32 to vector<8x128xf32>
    %349 = arith.mulf %348, %347 : vector<8x128xf32>
    %350 = math.tanh %349 : vector<8x128xf32>
    %cst_170 = arith.constant 5.000000e-01 : f32
    %351 = vector.broadcast %cst_170 : f32 to vector<8x128xf32>
    %352 = arith.mulf %351, %350 : vector<8x128xf32>
    %cst_171 = arith.constant 5.000000e-01 : f32
    %353 = vector.broadcast %cst_171 : f32 to vector<8x128xf32>
    %354 = arith.addf %352, %353 : vector<8x128xf32>
    %355 = vector.extract_strided_slice %338 {offsets = [0, 256], sizes = [8, 128], strides = [1, 1]} : vector<8x512xf32> to vector<8x128xf32>
    %356 = math.tanh %355 : vector<8x128xf32>
    %357 = vector.extract_strided_slice %338 {offsets = [0, 384], sizes = [8, 128], strides = [1, 1]} : vector<8x512xf32> to vector<8x128xf32>
    %cst_172 = arith.constant 5.000000e-01 : f32
    %358 = vector.broadcast %cst_172 : f32 to vector<8x128xf32>
    %359 = arith.mulf %358, %357 : vector<8x128xf32>
    %360 = math.tanh %359 : vector<8x128xf32>
    %cst_173 = arith.constant 5.000000e-01 : f32
    %361 = vector.broadcast %cst_173 : f32 to vector<8x128xf32>
    %362 = arith.mulf %361, %360 : vector<8x128xf32>
    %cst_174 = arith.constant 5.000000e-01 : f32
    %363 = vector.broadcast %cst_174 : f32 to vector<8x128xf32>
    %364 = arith.addf %362, %363 : vector<8x128xf32>
    %365 = arith.mulf %354, %330 : vector<8x128xf32>
    %366 = arith.mulf %346, %356 : vector<8x128xf32>
    %367 = arith.addf %365, %366 : vector<8x128xf32>
    %368 = math.tanh %367 : vector<8x128xf32>
    %369 = arith.mulf %364, %368 : vector<8x128xf32>
    %370 = arith.truncf %369 : vector<8x128xf32> to vector<8x128xbf16>
    %c56_175 = arith.constant 56 : index
    %c0_176 = arith.constant 0 : index
    %371 = vector.load %arg10[%c56_175, %c0_176] : memref<64x128xbf16, #tpu.memory_space<vmem>>, vector<8x128xbf16>
    tpu.vector_store %arg10[%c56_175, %c0_176], %370 {strides = array<i32>} : memref<64x128xbf16, #tpu.memory_space<vmem>>, vector<8x128xbf16>,
    %c0_177 = arith.constant 0 : index
    %c0_178 = arith.constant 0 : index
    %372 = vector.load %arg10[%c0_177, %c0_178] : memref<64x128xbf16, #tpu.memory_space<vmem>>, vector<64x128xbf16>
    %c0_179 = arith.constant 0 : index
    %c0_180 = arith.constant 0 : index
    %373 = vector.load %arg5[%c0_179, %c0_180] : memref<128x128xbf16, #tpu.memory_space<vmem>>, vector<128x128xbf16>
    %cst_181 = arith.constant dense<0.000000e+00> : vector<64x128xf32>
    %374 = tpu.matmul %372, %373, %cst_181 {dimension_numbers = #tpu.dot_dimension_numbers<[1], [0], [0], [1], [0, 0, 1, 1], [], []>} : vector<64x128xbf16>, vector<128x128xbf16>, vector<64x128xf32> -> vector<64x128xf32>
    %c0_182 = arith.constant 0 : index
    %c0_183 = arith.constant 0 : index
    %375 = vector.load %arg6[%c0_182, %c0_183] : memref<1x128xf32, #tpu.memory_space<vmem>>, vector<1x128xf32>
    %376 = vector.broadcast %375 : vector<1x128xf32> to vector<64x128xf32>
    %377 = arith.addf %374, %376 : vector<64x128xf32>
    %c0_184 = arith.constant 0 : index
    %c0_185 = arith.constant 0 : index
    %378 = vector.load %arg7[%c0_184, %c0_185] : memref<64x128xf32, #tpu.memory_space<vmem>>, vector<64x128xf32>
    tpu.vector_store %arg7[%c0_184, %c0_185], %377 {strides = array<i32>} : memref<64x128xf32, #tpu.memory_space<vmem>>, vector<64x128xf32>,
    return
  }
}

</mosaic_0001>

<bundles_post_ra>
// kernel: seq2seq_forward.1
= control target key start
LH: loop header
LB: loop body
LE: loop exit
PB: predicated region body
PF: predicated region fallthrough
CT: control target
= control target key end

     0   :  { %12 = vsyncpa [#allocation7], 0  ;;  %s4630_s0 = inlined_call_operand.vmem [shape: s32[16], index: 0, kind: input, shape index: {}]   ;;  %s4631_s1 = inlined_call_operand.hbm [shape: f32[30,128], index: 1, kind: input, shape index: {}]   ;;  %s4632_s2 = inlined_call_operand.hbm [shape: bf16[128,512], index: 2, kind: input, shape index: {}]   ;;  %s4633_s3 = inlined_call_operand.hbm [shape: bf16[128,512], index: 3, kind: input, shape index: {}]   ;;  %s4634_s4 = inlined_call_operand.vmem [shape: f32[1,512], index: 4, kind: input, shape index: {}]   ;;  %s4635_s5 = inlined_call_operand.hbm [shape: bf16[128,128], index: 5, kind: input, shape index: {}]   ;;  %s4636_s6 = inlined_call_operand.vmem [shape: f32[1,128], index: 6, kind: input, shape index: {}]   ;;  %s4637_s7 = inlined_call_operand.vmem [shape: f32[64,128], index: 7, kind: output, shape index: {}]  }
   0x1   :  { %13 = vsyncpa [#allocation6], 0 }
   0x2   :  { %14 = vsyncpa [#allocation10], 0 }
   0x3   :  { %15 = vsyncpa [#allocation13], 0  ;;  %s3896_s24 = smov [#allocation9]   ;;  %s22_s28 = sshll.u32 %s4630_s0, 4  ;;  %s23_s28 = int_to_ptr.vmem [resolvable:$true] %s22_s28 }
   0x4   :  { %s43_s25 = sshll.u32 %s3896_s24, 4  ;;  %s3788_s8 = scalar_lea.hbm %s4632_s2, 4096  ;;  %s44_s25 = int_to_ptr.vmem [resolvable:$true] %s43_s25 }
   0x5   :  { %p3789_p0 = scmp.ne.s32.totalorder %s4632_s2, %s3788_s8  ;;  %p3792_p1 = scmp.lt.u32.totalorder %s3788_s8, %s4632_s2 }
   0x7   :  { %p3794_p2 = pnand %p3792_p1, %p3789_p0 }
   0x9   :  { %3797 = shalt.err (!%p3794_p2)
}
   0xa   :  { %s3798_s13 = scalar_lea.vmem %s44_s25, 4096  ;;  %p3803_p4 = scmp.lt.s32.totalorder %s44_s25, %s44_s25 }
   0xb   :  { %p3799_p3 = scmp.ne.s32.totalorder %s44_s25, %s3798_s13  ;;  %p3804_p5 = scmp.lt.s32.totalorder %s3798_s13, %s3798_s13 }
   0xd   :  { %p3805_p6 = por %p3804_p5, %p3803_p4 }
   0xf   :  { %p3806_p7 = pnand %p3805_p6, %p3799_p3 }
  0x11   :  { %3809 = shalt.err (!%p3806_p7)
}
  0x12   :  { %s3897_s0 = smov 256   ;;  %s3898_s14 = smov 16  }
  0x13   :  { %49 = dma.hbm_to_vmem [thread:$0]  %s4632_s2, 4096, %s44_s25, [#allocation10], %s3897_s0, %s3897_s0, %s3898_s14  }
  0x14   :  { %s3810_s17 = scalar_lea.vmem %s23_s28, 16  ;;  %p3815_p9 = scmp.lt.s32.totalorder %s23_s28, %s23_s28 }
  0x15   :  { %p3811_p8 = scmp.ne.s32.totalorder %s23_s28, %s3810_s17  ;;  %p3816_p10 = scmp.lt.s32.totalorder %s3810_s17, %s3810_s17 }
  0x17   :  { %p3817_p11 = por %p3816_p10, %p3815_p9 }
  0x19   :  { %p3818_p12 = pnand %p3817_p11, %p3811_p8 }
  0x1b   :  { %3821 = shalt.err (!%p3818_p12)
}
  0x1c   :  { %s3899_s18 = smov [#allocation5]   ;;  %s3900_s19 = smov [#allocation8]  }
  0x1d   :  { %25 = dma.vmem_to_smem %s23_s28, 16, %s3899_s18, [#allocation7]  }
  0x1e   :  { %s31_s20 = sshll.u32 %s3900_s19, 4  ;;  %s3822_s23 = scalar_lea.hbm %s4631_s1, 512  ;;  %s32_s20 = int_to_ptr.vmem [resolvable:$true] %s31_s20 }
  0x1f   :  { %p3823_p13 = scmp.ne.s32.totalorder %s4631_s1, %s3822_s23  ;;  %p3826_p0 = scmp.lt.u32.totalorder %s3822_s23, %s4631_s1 }
  0x21   :  { %p3828_p1 = pnand %p3826_p0, %p3823_p13 }
  0x23   :  { %3831 = shalt.err (!%p3828_p1)
}
  0x24   :  { %s3832_s27 = scalar_lea.vmem %s32_s20, 512  ;;  %p3837_p3 = scmp.lt.s32.totalorder %s32_s20, %s32_s20 }
  0x25   :  { %p3833_p2 = scmp.ne.s32.totalorder %s32_s20, %s3832_s27  ;;  %p3838_p4 = scmp.lt.s32.totalorder %s3832_s27, %s3832_s27 }
  0x27   :  { %p3839_p5 = por %p3838_p4, %p3837_p3 }
  0x29   :  { %p3840_p6 = pnand %p3839_p5, %p3833_p2 }
  0x2b   :  { %3843 = shalt.err (!%p3840_p6)
}
  0x2c   :  { %s3901_s28 = smov 128   ;;  %s3902_s29 = smov 8  }
  0x2d   :  { %37 = dma.hbm_to_vmem [thread:$0]  %s4631_s1, 512, %s32_s20, [#allocation6], %s3901_s28, %s3901_s28, %s3902_s29  }
  0x2e   :  { %s3903_s9 = smov [#allocation11]   ;;  %s3904_s11 = smov [#allocation12]  }
  0x2f   :  { %s55_s10 = sshll.u32 %s3903_s9, 4  ;;  %s69_s12 = sshll.u32 %s3904_s11, 4  ;;  %s56_s10 = int_to_ptr.vmem [resolvable:$true] %s55_s10  ;;  %s70_s12 = int_to_ptr.vmem [resolvable:$true] %s69_s12 }
  0x30   :  { %s3844_s16 = scalar_lea.hbm %s4633_s3, 4096 }
  0x31   :  { %p3845_p7 = scmp.ne.s32.totalorder %s4633_s3, %s3844_s16  ;;  %p3848_p8 = scmp.lt.u32.totalorder %s3844_s16, %s4633_s3 }
  0x33   :  { %p3850_p9 = pnand %p3848_p8, %p3845_p7 }
  0x35   :  { %3853 = shalt.err (!%p3850_p9)
}
  0x36   :  { %s3854_s1 = scalar_lea.vmem %s56_s10, 4096  ;;  %p3859_p11 = scmp.lt.s32.totalorder %s56_s10, %s56_s10 }
  0x37   :  { %p3855_p10 = scmp.ne.s32.totalorder %s56_s10, %s3854_s1  ;;  %p3860_p12 = scmp.lt.s32.totalorder %s3854_s1, %s3854_s1 }
  0x39   :  { %p3861_p13 = por %p3860_p12, %p3859_p11 }
  0x3b   :  { %p3862_p0 = pnand %p3861_p13, %p3855_p10 }
  0x3d   :  { %3865 = shalt.err (!%p3862_p0)
}
  0x3e   :  { %61 = dma.hbm_to_vmem [thread:$0]  %s4633_s3, 4096, %s56_s10, [#allocation10], %s3897_s0, %s3897_s0, %s3898_s14  }
  0x3f   :  { %s3866_s26 = scalar_lea.hbm %s4635_s5, 1024 }
  0x40   :  { %p3867_p1 = scmp.ne.s32.totalorder %s4635_s5, %s3866_s26  ;;  %p3870_p2 = scmp.lt.u32.totalorder %s3866_s26, %s4635_s5 }
  0x42   :  { %p3872_p3 = pnand %p3870_p2, %p3867_p1 }
  0x44   :  { %3875 = shalt.err (!%p3872_p3)
}
  0x45   :  { %s3876_s29 = scalar_lea.vmem %s70_s12, 1024  ;;  %p3881_p5 = scmp.lt.s32.totalorder %s70_s12, %s70_s12 }
  0x46   :  { %p3877_p4 = scmp.ne.s32.totalorder %s70_s12, %s3876_s29  ;;  %p3882_p6 = scmp.lt.s32.totalorder %s3876_s29, %s3876_s29 }
  0x48   :  { %p3883_p7 = por %p3882_p6, %p3881_p5 }
  0x4a   :  { %p3884_p8 = pnand %p3883_p7, %p3877_p4 }
  0x4c   :  { %3887 = shalt.err (!%p3884_p8)
}
  0x4d   :  { %s3905_s3 = smov 64   ;;  %s3906_s0 = smov 4  }
  0x4e   :  { %75 = dma.hbm_to_vmem [thread:$0]  %s4635_s5, 1024, %s70_s12, [#allocation13], %s3905_s3, %s3905_s3, %s3906_s0  }
  0x4f   :  { %3888 = dma.done.wait [#allocation7], 16  }
  0x50   :  { %3889 = vsyncadd [#allocation7], 4294967280 }
  0x51   :  { %3890 = dma.done.wait [#allocation6], 512  }
  0x52   :  { %3891 = vsyncadd [#allocation6], 4294966784 }
  0x53   :  { %3892 = dma.done.wait [#allocation10], 8192  }
  0x54   :  { %3893 = vsyncadd [#allocation10], 4294959104 }
  0x55   :  { %3894 = dma.done.wait [#allocation13], 1024  }
  0x56   :  { %3895 = vsyncadd [#allocation13], 4294966272 }
  0x57   :  { %93 = sfence }
  0x58   :  { %v3532_v0 = vld [vmem:[#allocation9 + $0x4] ss:$16 sps:$4 sm:$0xff]   ;;  %v3534_v1 = vld [vmem:[#allocation9] ss:$16 sps:$4 sm:$0xff]   ;;  %v4638_v2 = vmov 0   ;;  %v3908_v3 = vmov 0.0  }
  0x59   :  { %425 = vmatprep.mubr.bf16.mxu1 %v4638_v2  ;;  %95 = vst [vmem:[#allocation2] sm:$0xff] %v3908_v3  ;;  %96 = vst [vmem:[#allocation2 + $0x8] sm:$0xff] %v3908_v3  ;;  %799 = vmatprep.mubr.bf16.mxu0 %v4638_v2  ;;  %v4008_v4 = vld [vmem:[#allocation11 + $0x4] ss:$16 sps:$4 sm:$0xff]   ;;  %v4010_v5 = vld [vmem:[#allocation11] ss:$16 sps:$4 sm:$0xff]  }
  0x5a   :  { %97 = vst [vmem:[#allocation2 + $0x10] sm:$0xff] %v3908_v3  ;;  %98 = vst [vmem:[#allocation2 + $0x18] sm:$0xff] %v3908_v3  ;;  %393 = vmatprep.subr.bf16.mxu1 %v3532_v0  ;;  %v3538_v6 = vld [vmem:[#allocation9 + $0x24] ss:$16 sps:$4 sm:$0xff]   ;;  %v3540_v7 = vld [vmem:[#allocation9 + $0x20] ss:$16 sps:$4 sm:$0xff]   ;;  %767 = vmatprep.subr.bf16.mxu0 %v4008_v4 }
  0x5b   :  { %99 = vst [vmem:[#allocation2 + $0x20] sm:$0xff] %v3908_v3  ;;  %100 = vst [vmem:[#allocation2 + $0x28] sm:$0xff] %v3908_v3  ;;  %394 = vmatpush1.bf16.msra.mxu1 %v3534_v1  ;;  %v4013_v8 = vld [vmem:[#allocation11 + $0x24] ss:$16 sps:$4 sm:$0xff]   ;;  %768 = vmatpush1.bf16.msra.mxu0 %v4010_v5  ;;  %v4016_v9 = vld [vmem:[#allocation11 + $0x20] ss:$16 sps:$4 sm:$0xff]  }
  0x5c   :  { %101 = vst [vmem:[#allocation2 + $0x30] sm:$0xff] %v3908_v3  ;;  %102 = vst [vmem:[#allocation2 + $0x38] sm:$0xff] %v3908_v3  ;;  %395 = vmatprep.subr.bf16.mxu1 %v3538_v6  ;;  %s4018_s5 = sld [smem:[#allocation5]]  ;;  %769 = vmatprep.subr.bf16.mxu0 %v4013_v8  ;;  %v3544_v10 = vld [vmem:[#allocation9 + $0x44] ss:$16 sps:$4 sm:$0xff]   ;;  %s4021_s8 = sld [smem:[#allocation5 + $0x1]] }
  0x5d   :  { %v3546_v11 = vld [vmem:[#allocation9 + $0x40] ss:$16 sps:$4 sm:$0xff]   ;;  %v4023_v12 = vld [vmem:[#allocation11 + $0x44] ss:$16 sps:$4 sm:$0xff]   ;;  %s4025_s9 = sld [smem:[#allocation5 + $0x2]]  ;;  %s4030_s10 = sld [smem:[#allocation5 + $0x3]] }
  0x5e   :  { %v3550_v13 = vld [vmem:[#allocation9 + $0x64] ss:$16 sps:$4 sm:$0xff]   ;;  %v4028_v14 = vld [vmem:[#allocation11 + $0x40] ss:$16 sps:$4 sm:$0xff]   ;;  %s4037_s11 = sld [smem:[#allocation5 + $0x4]]  ;;  %s4043_s12 = sld [smem:[#allocation5 + $0x5]] }
  0x5f   :  { %396 = vmatpush1.bf16.msra.mxu1 %v3540_v7  ;;  %770 = vmatpush1.bf16.msra.mxu0 %v4016_v9  ;;  %v3552_v15 = vld [vmem:[#allocation9 + $0x60] ss:$16 sps:$4 sm:$0xff]   ;;  %v4033_v16 = vld [vmem:[#allocation11 + $0x64] ss:$16 sps:$4 sm:$0xff]   ;;  %s4047_s13 = sld [smem:[#allocation5 + $0x6]]  ;;  %s4049_s15 = sld [smem:[#allocation5 + $0x7]] }
  0x60   :  { %397 = vmatprep.subr.bf16.mxu1 %v3544_v10  ;;  %771 = vmatprep.subr.bf16.mxu0 %v4023_v12  ;;  %v4035_v17 = vld [vmem:[#allocation11 + $0x60] ss:$16 sps:$4 sm:$0xff]   ;;  %v3556_v18 = vld [vmem:[#allocation9 + $0x84] ss:$16 sps:$4 sm:$0xff]   ;;  %s4055_s16 = sld [smem:[#allocation5 + $0x8]]  ;;  %s4059_s17 = sld [smem:[#allocation5 + $0x9]] }
  0x61   :  { %v3558_v19 = vld [vmem:[#allocation9 + $0x80] ss:$16 sps:$4 sm:$0xff]   ;;  %v4041_v20 = vld [vmem:[#allocation11 + $0x84] ss:$16 sps:$4 sm:$0xff]   ;;  %s4071_s20 = sld [smem:[#allocation5 + $0xa]]  ;;  %s4081_s2 = sld [smem:[#allocation5 + $0xb]] }
  0x62   :  { %v4045_v21 = vld [vmem:[#allocation11 + $0x80] ss:$16 sps:$4 sm:$0xff]   ;;  %v3562_v22 = vld [vmem:[#allocation9 + $0xa4] ss:$16 sps:$4 sm:$0xff]   ;;  %s104_s18 = scalar_lea.vmem [#allocation8], %s4018_s5  ;;  %s108_s19 = scalar_lea.vmem [#allocation8], %s4021_s8 }
  0x63   :  { %398 = vmatpush1.bf16.msra.mxu1 %v3546_v11  ;;  %772 = vmatpush1.bf16.msra.mxu0 %v4028_v14  ;;  %v3564_v23 = vld [vmem:[#allocation9 + $0xa0] ss:$16 sps:$4 sm:$0xff]   ;;  %v4053_v24 = vld [vmem:[#allocation11 + $0xa4] ss:$16 sps:$4 sm:$0xff]   ;;  %s112_s21 = scalar_lea.vmem [#allocation8], %s4025_s9  ;;  %s116_s1 = scalar_lea.vmem [#allocation8], %s4030_s10 }
  0x64   :  { %399 = vmatprep.subr.bf16.mxu1 %v3550_v13  ;;  %773 = vmatprep.subr.bf16.mxu0 %v4033_v16  ;;  %v4057_v25 = vld [vmem:[#allocation11 + $0xa0] ss:$16 sps:$4 sm:$0xff]   ;;  %v3568_v26 = vld [vmem:[#allocation9 + $0xc4] ss:$16 sps:$4 sm:$0xff]   ;;  %s120_s22 = scalar_lea.vmem [#allocation8], %s4037_s11  ;;  %s124_s23 = scalar_lea.vmem [#allocation8], %s4043_s12 }
  0x65   :  { %v3570_v27 = vld [vmem:[#allocation9 + $0xc0] ss:$16 sps:$4 sm:$0xff]   ;;  %v4062_v28 = vld [vmem:[#allocation11 + $0xc4] ss:$16 sps:$4 sm:$0xff]   ;;  %s128_s24 = scalar_lea.vmem [#allocation8], %s4047_s13  ;;  %s132_s26 = scalar_lea.vmem [#allocation8], %s4049_s15 }
  0x66   :  { %v105_v29 = vld [vmem:[%s104_s18] sm:$0x1]  ;;  %v3574_v34 = vld [vmem:[#allocation9 + $0xe4] ss:$16 sps:$4 sm:$0xff]   ;;  %v3582_v41 = vld [vmem:[#allocation9 + $0xc] ss:$16 sps:$4 sm:$0xff]  }
  0x67   :  { %400 = vmatpush1.bf16.msra.mxu1 %v3552_v15  ;;  %774 = vmatpush1.bf16.msra.mxu0 %v4035_v17  ;;  %v109_v30 = vld [vmem:[%s108_s19] sm:$0x1]  ;;  %106 = vst [vmem:[#allocation2] sm:$0x1] %v105_v29  ;;  %v4074_v35 = vld [vmem:[#allocation11 + $0xe4] ss:$16 sps:$4 sm:$0xff]  }
  0x68   :  { %401 = vmatprep.subr.bf16.mxu1 %v3556_v18  ;;  %775 = vmatprep.subr.bf16.mxu0 %v4041_v20  ;;  %110 = vst [vmem:[#allocation2 + $0x1] sm:$0x1] %v109_v30  ;;  %v113_v31 = vld [vmem:[%s112_s21] sm:$0x1]  ;;  %s136_s25 = scalar_lea.vmem [#allocation8], %s4055_s16  ;;  %s140_s27 = scalar_lea.vmem [#allocation8], %s4059_s17 }
  0x69   :  { %v117_v32 = vld [vmem:[%s116_s1] sm:$0x1]  ;;  %114 = vst [vmem:[#allocation2 + $0x8] sm:$0x1] %v113_v31  ;;  %v3580_v48 = vld [vmem:[#allocation9 + $0x8] ss:$16 sps:$4 sm:$0xff]   ;;  %v213_v31 = vlaneseq }
  0x6a   :  { %v4069_v33 = vld [vmem:[#allocation11 + $0xc0] ss:$16 sps:$4 sm:$0xff]   ;;  %118 = vst [vmem:[#allocation2 + $0x9] sm:$0x1] %v117_v32  ;;  %s144_s28 = scalar_lea.vmem [#allocation8], %s4071_s20  ;;  %s3182_s29 = sld [smem:[#allocation5 + $0xc]] }
  0x6b   :  { %402 = vmatpush1.bf16.msra.mxu1 %v3558_v19  ;;  %776 = vmatpush1.bf16.msra.mxu0 %v4045_v21  ;;  %v121_v36 = vld [vmem:[%s120_s22] sm:$0x1]  ;;  %v3585_v50 = vld [vmem:[#allocation9 + $0x2c] ss:$16 sps:$4 sm:$0xff]   ;;  %v3583_v51 = vld [vmem:[#allocation9 + $0x28] ss:$16 sps:$4 sm:$0xff]  }
  0x6c   :  { %403 = vmatprep.subr.bf16.mxu1 %v3562_v22  ;;  %777 = vmatprep.subr.bf16.mxu0 %v4053_v24  ;;  %v125_v37 = vld [vmem:[%s124_s23] sm:$0x1]  ;;  %122 = vst [vmem:[#allocation2 + $0x10] sm:$0x1] %v121_v36  ;;  %s3183_s3 = sld [smem:[#allocation5 + $0xd]]  ;;  %s148_s0 = scalar_lea.vmem [#allocation8], %s4081_s2 }
  0x6d   :  { %126 = vst [vmem:[#allocation2 + $0x11] sm:$0x1] %v125_v37  ;;  %v129_v38 = vld [vmem:[%s128_s24] sm:$0x1]  ;;  %s3184_s14 = sld [smem:[#allocation5 + $0xe]]  ;;  %s3185_s30 = sld [smem:[#allocation5 + $0xf]] }
  0x6e   :  { %v133_v39 = vld [vmem:[%s132_s26] sm:$0x1]  ;;  %130 = vst [vmem:[#allocation2 + $0x18] sm:$0x1] %v129_v38  ;;  %v3588_v55 = vld [vmem:[#allocation9 + $0x4c] ss:$16 sps:$4 sm:$0xff]  }
  0x6f   :  { %404 = vmatpush1.bf16.msra.mxu1 %v3564_v23  ;;  %778 = vmatpush1.bf16.msra.mxu0 %v4057_v25  ;;  %v3576_v40 = vld [vmem:[#allocation9 + $0xe0] ss:$16 sps:$4 sm:$0xff]   ;;  %134 = vst [vmem:[#allocation2 + $0x19] sm:$0x1] %v133_v39  ;;  %v3586_v57 = vld [vmem:[#allocation9 + $0x48] ss:$16 sps:$4 sm:$0xff]  }
  0x70   :  { %405 = vmatprep.subr.bf16.mxu1 %v3568_v26  ;;  %779 = vmatprep.subr.bf16.mxu0 %v4062_v28  ;;  %v4084_v42 = vld [vmem:[#allocation11 + $0xe0] ss:$16 sps:$4 sm:$0xff]   ;;  %s152_s5 = scalar_lea.vmem [#allocation8], %s3182_s29  ;;  %v3591_v59 = vld [vmem:[#allocation9 + $0x6c] ss:$16 sps:$4 sm:$0xff]   ;;  %v214_v32 = vshrl.u32 %v213_v31, 7 }
  0x71   :  { %v167_v43 = vld [vmem:[#allocation2] sm:$0xff]  ;;  %v168_v45 = vld [vmem:[#allocation2 + $0x8] sm:$0xff] }
  0x72   :  { %v137_v44 = vld [vmem:[%s136_s25] sm:$0x1]  ;;  %v4089_v47 = vpack.c.bf16 %v168_v45, %v167_v43  ;;  %v3589_v60 = vld [vmem:[#allocation9 + $0x68] ss:$16 sps:$4 sm:$0xff]   ;;  %s156_s8 = scalar_lea.vmem [#allocation8], %s3183_s3 }
  0x73   :  { %406 = vmatpush1.bf16.msra.mxu1 %v3570_v27  ;;  %780 = vmatpush1.bf16.msra.mxu0 %v4069_v33  ;;  %138 = vst [vmem:[#allocation2 + $0x20] sm:$0x1] %v137_v44  ;;  %v141_v46 = vld [vmem:[%s140_s27] sm:$0x1]  ;;  %s160_s9 = scalar_lea.vmem [#allocation8], %s3184_s14  ;;  %s164_s10 = scalar_lea.vmem [#allocation8], %s3185_s30 }
  0x74   :  { %407 = vmatprep.subr.bf16.mxu1 %v3574_v34  ;;  %781 = vmatprep.subr.bf16.mxu0 %v4074_v35  ;;  %142 = vst [vmem:[#allocation2 + $0x21] sm:$0x1] %v141_v46  ;;  %v145_v49 = vld [vmem:[%s144_s28] sm:$0x1]  ;;  %v169_v52 = vld [vmem:[#allocation2 + $0x10] sm:$0xff] }
  0x75   :  { %146 = vst [vmem:[#allocation2 + $0x28] sm:$0x1] %v145_v49  ;;  %v149_v54 = vld [vmem:[%s148_s0] sm:$0x1]  ;;  %v3594_v3 = vld [vmem:[#allocation9 + $0x8c] ss:$16 sps:$4 sm:$0xff]  }
  0x76   :  { %v170_v53 = vld [vmem:[#allocation2 + $0x18] sm:$0xff]  ;;  %150 = vst [vmem:[#allocation2 + $0x29] sm:$0x1] %v149_v54  ;;  %v153_v58 = vld [vmem:[%s152_s5] sm:$0x1] }
  0x77   :  { %408 = vmatpush1.bf16.msra.mxu1 %v3576_v40  ;;  %782 = vmatpush1.bf16.msra.mxu0 %v4084_v42  ;;  %v4100_v56 = vpack.c.bf16 %v170_v53, %v169_v52  ;;  %154 = vst [vmem:[#allocation2 + $0x30] sm:$0x1] %v153_v58  ;;  %v157_v61 = vld [vmem:[%s156_s8] sm:$0x1]  ;;  %v3597_v6 = vld [vmem:[#allocation9 + $0xac] ss:$16 sps:$4 sm:$0xff]  }
  0x78   :  { %466 = vmatprep.subr.bf16.mxu1 %v3582_v41  ;;  %1069 = vmatprep.subr.bf16.mxu0 %v4008_v4  ;;  %158 = vst [vmem:[#allocation2 + $0x31] sm:$0x1] %v157_v61  ;;  %v161_v62 = vld [vmem:[%s160_s9] sm:$0x1]  ;;  %v3595_v7 = vld [vmem:[#allocation9 + $0xa8] ss:$16 sps:$4 sm:$0xff]  }
  0x79   :  { %v165_v63 = vld [vmem:[%s164_s10] sm:$0x1]  ;;  %162 = vst [vmem:[#allocation2 + $0x38] sm:$0x1] %v161_v62  ;;  %v3600_v10 = vld [vmem:[#allocation9 + $0xcc] ss:$16 sps:$4 sm:$0xff]  }
  0x7a   :  { %426 = vmatmul.mubr.bf16.vlgmr.msra.gmra.mrb[0].mxu1 %v4089_v47  ;;  %800 = vmatmul.mubr.bf16.vlgmr.msra.gmra.mrb[0].mxu0 %v4638_v2  ;;  %166 = vst [vmem:[#allocation2 + $0x39] sm:$0x1] %v165_v63  ;;  %v3598_v11 = vld [vmem:[#allocation9 + $0xc8] ss:$16 sps:$4 sm:$0xff]   ;;  %v3603_v13 = vld [vmem:[#allocation9 + $0xec] ss:$16 sps:$4 sm:$0xff]  }
  0x7b   :  { %467 = vmatpush1.bf16.msra.mxu1 %v3580_v48  ;;  %435 = vmatprep.mubr.bf16.mxu1 %v4638_v2  ;;  %v171_v0 = vld [vmem:[#allocation2 + $0x20] sm:$0xff]  ;;  %v4115_v15 = vld [vmem:[#allocation11 + $0xc] ss:$16 sps:$4 sm:$0xff]   ;;  %v4126_v18 = vld [vmem:[#allocation11 + $0x28] ss:$16 sps:$4 sm:$0xff]  }
  0x7c   :  { %468 = vmatprep.subr.bf16.mxu1 %v3585_v50  ;;  %1070 = vmatpush1.bf16.msra.mxu0 %v4010_v5  ;;  %v3592_v5 = vld [vmem:[#allocation9 + $0x88] ss:$16 sps:$4 sm:$0xff]   ;;  %v4130_v19 = vld [vmem:[#allocation11 + $0x4c] ss:$16 sps:$4 sm:$0xff]   ;;  %v211_v34 = vld [vmem:[%s4634_s4] sm:$0xf] }
  0x7d   :  { %1101 = vmatprep.mubr.bf16.mxu0 %v4638_v2  ;;  %1071 = vmatprep.subr.bf16.mxu0 %v4013_v8  ;;  %v172_v1 = vld [vmem:[#allocation2 + $0x28] sm:$0xff] }
  0x7e   :  { %v177_v4 = vpack.c.bf16 %v172_v1, %v171_v0  ;;  %v4143_v22 = vld [vmem:[#allocation11 + $0x68] ss:$16 sps:$4 sm:$0xff]   ;;  %v4147_v23 = vld [vmem:[#allocation11 + $0x8c] ss:$16 sps:$4 sm:$0xff]  }
  0x7f   :  { %469 = vmatpush1.bf16.msra.mxu1 %v3583_v51  ;;  %v173_v8 = vld [vmem:[#allocation2 + $0x30] sm:$0xff]  ;;  %v4156_v26 = vld [vmem:[#allocation11 + $0xa8] ss:$16 sps:$4 sm:$0xff]   ;;  %v4160_v27 = vld [vmem:[#allocation11 + $0xcc] ss:$16 sps:$4 sm:$0xff]  }
  0x80   :  { %470 = vmatprep.subr.bf16.mxu1 %v3588_v55  ;;  %1072 = vmatpush1.bf16.msra.mxu0 %v4016_v9  ;;  %v4166_v29 = vld [vmem:[#allocation11 + $0xec] ss:$16 sps:$4 sm:$0xff]   ;;  %v4169_v30 = vld [vmem:[#allocation11 + $0xe8] ss:$16 sps:$4 sm:$0xff]  }
  0x81   :  { %1073 = vmatprep.subr.bf16.mxu0 %v4023_v12  ;;  %v174_v9 = vld [vmem:[#allocation2 + $0x38] sm:$0xff] }
  0x82   :  { %436 = vmatmul.mubr.bf16.gmra.mrb[4].mxu1 %v4100_v56  ;;  %v178_v12 = vpack.c.bf16 %v174_v9, %v173_v8 }
  0x83   :  { %471 = vmatpush1.bf16.msra.mxu1 %v3586_v57  ;;  %445 = vmatprep.mubr.bf16.mxu1 %v4638_v2 }
  0x84   :  { %472 = vmatprep.subr.bf16.mxu1 %v3591_v59  ;;  %1074 = vmatpush1.bf16.msra.mxu0 %v4028_v14  ;;  %v3601_v14 = vld [vmem:[#allocation9 + $0xe8] ss:$16 sps:$4 sm:$0xff]  }
  0x85   :  { %1075 = vmatprep.subr.bf16.mxu0 %v4033_v16  ;;  %v4119_v16 = vld [vmem:[#allocation11 + $0x8] ss:$16 sps:$4 sm:$0xff]  }
  0x87   :  { %473 = vmatpush1.bf16.msra.mxu1 %v3589_v60 }
  0x88   :  { %474 = vmatprep.subr.bf16.mxu1 %v3594_v3  ;;  %1076 = vmatpush1.bf16.msra.mxu0 %v4035_v17  ;;  %v4122_v17 = vld [vmem:[#allocation11 + $0x2c] ss:$16 sps:$4 sm:$0xff]  }
  0x89   :  { %1077 = vmatprep.subr.bf16.mxu0 %v4041_v20  ;;  %v4135_v20 = vld [vmem:[#allocation11 + $0x48] ss:$16 sps:$4 sm:$0xff]  }
  0x8a   :  { %446 = vmatmul.mubr.bf16.gmra.mrb[8].mxu1 %v177_v4 }
  0x8b   :  { %475 = vmatpush1.bf16.msra.mxu1 %v3592_v5  ;;  %455 = vmatprep.mubr.bf16.mxu1 %v4638_v2 }
  0x8c   :  { %476 = vmatprep.subr.bf16.mxu1 %v3597_v6  ;;  %1078 = vmatpush1.bf16.msra.mxu0 %v4045_v21  ;;  %v4137_v21 = vld [vmem:[#allocation11 + $0x6c] ss:$16 sps:$4 sm:$0xff]  }
  0x8d   :  { %1079 = vmatprep.subr.bf16.mxu0 %v4053_v24  ;;  %v4150_v24 = vld [vmem:[#allocation11 + $0x88] ss:$16 sps:$4 sm:$0xff]  }
  0x8f   :  { %477 = vmatpush1.bf16.msra.mxu1 %v3595_v7 }
  0x90   :  { %478 = vmatprep.subr.bf16.mxu1 %v3600_v10  ;;  %1080 = vmatpush1.bf16.msra.mxu0 %v4057_v25  ;;  %v4153_v25 = vld [vmem:[#allocation11 + $0xac] ss:$16 sps:$4 sm:$0xff]  }
  0x91   :  { %1081 = vmatprep.subr.bf16.mxu0 %v4062_v28  ;;  %v4163_v28 = vld [vmem:[#allocation11 + $0xc8] ss:$16 sps:$4 sm:$0xff]  }
  0x92   :  { %456 = vmatmul.mubr.bf16.gmra.mrb[12].mxu1 %v178_v12 }
  0x93   :  { %479 = vmatpush1.bf16.msra.mxu1 %v3598_v11  ;;  %498 = vmatprep.mubr.bf16.mxu1 %v4638_v2 }
  0x94   :  { %480 = vmatprep.subr.bf16.mxu1 %v3603_v13  ;;  %1082 = vmatpush1.bf16.msra.mxu0 %v4069_v33  ;;  %v215_v33 = vsub.s32 0, %v214_v32  ;;  %v223_v13 = vsub.s32 2, %v214_v32 }
  0x95   :  { %1083 = vmatprep.subr.bf16.mxu0 %v4074_v35  ;;  %v219_v35 = vsub.s32 1, %v214_v32 }
  0x96   :  { %v216_v36 = vrot.slane %v211_v34, %v215_v33  ;;  %v224_v33 = vrot.slane %v211_v34, %v223_v13 }
  0x97   :  { %481 = vmatpush1.bf16.msra.mxu1 %v3601_v14  ;;  %v220_v37 = vrot.slane %v211_v34, %v219_v35  ;;  %v227_v14 = vsub.s32 3, %v214_v32 }
  0x98   :  { %808 = vmatprep.subr.bf16.mxu1 %v4115_v15  ;;  %1084 = vmatpush1.bf16.msra.mxu0 %v4084_v42 }
  0x9a   :  { %499 = vmatmul.mubr.bf16.vlgmr.msra.gmra.mrb[16].mxu1 %v4089_v47 }
  0x9b   :  { %809 = vmatpush1.bf16.msra.mxu1 %v4119_v16  ;;  %508 = vmatprep.mubr.bf16.mxu1 %v4638_v2 }
  0x9c   :  { %810 = vmatprep.subr.bf16.mxu1 %v4122_v17 }
  0x9f   :  { %811 = vmatpush1.bf16.msra.mxu1 %v4126_v18 }
  0xa0   :  { %812 = vmatprep.subr.bf16.mxu1 %v4130_v19 }
  0xa2   :  { %509 = vmatmul.mubr.bf16.gmra.mrb[20].mxu1 %v4100_v56 }
  0xa3   :  { %813 = vmatpush1.bf16.msra.mxu1 %v4135_v20  ;;  %518 = vmatprep.mubr.bf16.mxu1 %v4638_v2 }
  0xa4   :  { %814 = vmatprep.subr.bf16.mxu1 %v4137_v21 }
  0xa7   :  { %815 = vmatpush1.bf16.msra.mxu1 %v4143_v22 }
  0xa8   :  { %816 = vmatprep.subr.bf16.mxu1 %v4147_v23 }
  0xaa   :  { %519 = vmatmul.mubr.bf16.gmra.mrb[24].mxu1 %v177_v4 }
  0xab   :  { %817 = vmatpush1.bf16.msra.mxu1 %v4150_v24  ;;  %528 = vmatprep.mubr.bf16.mxu1 %v4638_v2 }
  0xac   :  { %818 = vmatprep.subr.bf16.mxu1 %v4153_v25 }
  0xaf   :  { %819 = vmatpush1.bf16.msra.mxu1 %v4156_v26 }
  0xb0   :  { %820 = vmatprep.subr.bf16.mxu1 %v4160_v27 }
  0xb2   :  { %529 = vmatmul.mubr.bf16.gmra.mrb[28].mxu1 %v178_v12 }
  0xb3   :  { %821 = vmatpush1.bf16.msra.mxu1 %v4163_v28  ;;  %840 = vmatprep.mubr.bf16.mxu1 %v4638_v2 }
  0xb4   :  { %822 = vmatprep.subr.bf16.mxu1 %v4166_v29 }
  0xb7   :  { %823 = vmatpush1.bf16.msra.mxu1 %v4169_v30 }
  0xb8   :  { %1110 = vmatprep.subr.bf16.mxu1 %v4115_v15 }
  0xba   :  { %841 = vmatmul.mubr.bf16.vlgmr.msra.gmra.mrb[32].mxu1 %v4638_v2 }
  0xbb   :  { %1111 = vmatpush1.bf16.msra.mxu1 %v4119_v16  ;;  %1142 = vmatprep.mubr.bf16.mxu1 %v4638_v2 }
  0xbc   :  { %1112 = vmatprep.subr.bf16.mxu1 %v4122_v17 }
  0xbf   :  { %1113 = vmatpush1.bf16.msra.mxu1 %v4126_v18 }
  0xc0   :  { %1114 = vmatprep.subr.bf16.mxu1 %v4130_v19 }
  0xc3   :  { %1115 = vmatpush1.bf16.msra.mxu1 %v4135_v20 }
  0xc4   :  { %1116 = vmatprep.subr.bf16.mxu1 %v4137_v21 }
  0xc7   :  { %1117 = vmatpush1.bf16.msra.mxu1 %v4143_v22 }
  0xc8   :  { %1118 = vmatprep.subr.bf16.mxu1 %v4147_v23 }
  0xcb   :  { %1119 = vmatpush1.bf16.msra.mxu1 %v4150_v24 }
  0xcc   :  { %1120 = vmatprep.subr.bf16.mxu1 %v4153_v25 }
  0xcf   :  { %1121 = vmatpush1.bf16.msra.mxu1 %v4156_v26 }
  0xd0   :  { %1122 = vmatprep.subr.bf16.mxu1 %v4160_v27 }
  0xd3   :  { %1123 = vmatpush1.bf16.msra.mxu1 %v4163_v28 }
  0xd4   :  { %1124 = vmatprep.subr.bf16.mxu1 %v4166_v29 }
  0xd7   :  { %1125 = vmatpush1.bf16.msra.mxu1 %v4169_v30 }
  0xd8   :  { %1415 = vmatprep.subr.bf16.mxu1 %v4115_v15 }
 0x14d   :  { %v427_v38 = vpop.f32.mrb[0].mxu1  ;;  %v801_v43 = vpop.f32.mrb[0].mxu0 }
 0x14e   :  { %v428_v39 = vadd.f32 %v427_v38, %v216_v36  ;;  %v429_v40 = vpop.f32.mrb[1].mxu1  ;;  %v803_v47 = vpop.f32.mrb[1].mxu0  ;;  %v228_v38 = vrot.slane %v211_v34, %v227_v14 }
 0x14f   :  { %v430_v41 = vadd.f32 %v429_v40, %v220_v37  ;;  %v431_v42 = vpop.f32.mrb[2].mxu1  ;;  %v805_v50 = vpop.f32.mrb[2].mxu0 }
 0x150   :  { %v4196_v44 = vadd.f32 %v431_v42, %v216_v36  ;;  %v849_v45 = vadd.f32 %v801_v43, %v428_v39  ;;  %v433_v46 = vpop.f32.mrb[3].mxu1  ;;  %v806_v51 = vpop.f32.mrb[3].mxu0 }
 0x151   :  { %v4198_v48 = vadd.f32 %v433_v46, %v220_v37  ;;  %v850_v49 = vadd.f32 %v803_v47, %v430_v41 }
 0x155   :  { %v437_v52 = vpop.f32.mrb[4].mxu1 }
 0x156   :  { %v4200_v53 = vadd.f32 %v437_v52, %v216_v36  ;;  %v439_v54 = vpop.f32.mrb[5].mxu1 }
 0x157   :  { %v4202_v55 = vadd.f32 %v439_v54, %v220_v37  ;;  %v441_v56 = vpop.f32.mrb[6].mxu1 }
 0x158   :  { %v4204_v57 = vadd.f32 %v441_v56, %v216_v36  ;;  %v443_v58 = vpop.f32.mrb[7].mxu1 }
 0x159   :  { %v4206_v59 = vadd.f32 %v443_v58, %v220_v37 }
 0x15d   :  { %v447_v60 = vpop.f32.mrb[8].mxu1 }
 0x15e   :  { %v4208_v61 = vadd.f32 %v447_v60, %v216_v36  ;;  %v449_v62 = vpop.f32.mrb[9].mxu1 }
 0x15f   :  { %v4210_v63 = vadd.f32 %v449_v62, %v220_v37  ;;  %v451_v0 = vpop.f32.mrb[10].mxu1 }
 0x160   :  { %v4212_v1 = vadd.f32 %v451_v0, %v216_v36  ;;  %v453_v3 = vpop.f32.mrb[11].mxu1 }
 0x161   :  { %4640 = vst [vmem:[#allocation18_spill] sm:$0xff] %v4210_v63  ;;  %v4214_v4 = vadd.f32 %v453_v3, %v220_v37  ;;  %v857_v3 = vmul.f32 0.5, %v850_v49 }
 0x162   :  { %4641 = vst [vmem:[#allocation19_spill] sm:$0xff] %v4212_v1 }
 0x163   :  { %4642 = vst [vmem:[#allocation20_spill] sm:$0xff] %v4214_v4  ;;  %3708 = vtanh.f32 %v857_v3 }
 0x165   :  { %v457_v5 = vpop.f32.mrb[12].mxu1 }
 0x166   :  { %v4216_v6 = vadd.f32 %v457_v5, %v216_v36  ;;  %v459_v7 = vpop.f32.mrb[13].mxu1  ;;  %v853_v5 = vmul.f32 0.5, %v849_v45 }
 0x167   :  { %v4218_v8 = vadd.f32 %v459_v7, %v220_v37  ;;  %v461_v9 = vpop.f32.mrb[14].mxu1 }
 0x168   :  { %4643 = vst [vmem:[#allocation21_spill] sm:$0xff] %v4216_v6  ;;  %v4220_v10 = vadd.f32 %v461_v9, %v216_v36  ;;  %v463_v11 = vpop.f32.mrb[15].mxu1  ;;  %3710 = vtanh.f32 %v853_v5 }
 0x169   :  { %4644 = vst [vmem:[#allocation22_spill] sm:$0xff] %v4218_v8  ;;  %v4222_v12 = vadd.f32 %v463_v11, %v220_v37 }
 0x16a   :  { %4645 = vst [vmem:[#allocation23_spill] sm:$0xff] %v4220_v10 }
 0x16b   :  { %4646 = vst [vmem:[#allocation24_spill] sm:$0xff] %v4222_v12 }
 0x16d   :  { %v500_v31 = vpop.f32.mrb[16].mxu1 }
 0x16e   :  { %v502_v35 = vpop.f32.mrb[17].mxu1 }
 0x16f   :  { %v504_v39 = vpop.f32.mrb[18].mxu1 }
 0x170   :  { %v4224_v40 = vadd.f32 %v504_v39, %v224_v33  ;;  %v506_v41 = vpop.f32.mrb[19].mxu1 }
 0x171   :  { %v4226_v42 = vadd.f32 %v506_v41, %v228_v38 }
 0x175   :  { %v510_v43 = vpop.f32.mrb[20].mxu1 }
 0x176   :  { %v4228_v46 = vadd.f32 %v510_v43, %v224_v33  ;;  %v512_v36 = vpop.f32.mrb[21].mxu1 }
 0x177   :  { %v4230_v47 = vadd.f32 %v512_v36, %v228_v38  ;;  %v514_v37 = vpop.f32.mrb[22].mxu1  ;;  %v501_v36 = vadd.f32 %v500_v31, %v224_v33 }
 0x178   :  { %v4232_v50 = vadd.f32 %v514_v37, %v224_v33  ;;  %v516_v32 = vpop.f32.mrb[23].mxu1  ;;  %v503_v37 = vadd.f32 %v502_v35, %v228_v38 }
 0x179   :  { %v4234_v51 = vadd.f32 %v516_v32, %v228_v38 }
 0x17d   :  { %v520_v52 = vpop.f32.mrb[24].mxu1 }
 0x17e   :  { %v4236_v34 = vadd.f32 %v520_v52, %v224_v33  ;;  %v522_v54 = vpop.f32.mrb[25].mxu1 }
 0x17f   :  { %v4238_v56 = vadd.f32 %v522_v54, %v228_v38  ;;  %v524_v58 = vpop.f32.mrb[26].mxu1 }
 0x180   :  { %v4240_v60 = vadd.f32 %v524_v58, %v224_v33  ;;  %v526_v62 = vpop.f32.mrb[27].mxu1  ;;  %v3709_v58 = vpop.eup %3708 }
 0x181   :  { %4647 = vst [vmem:[#allocation25_spill] sm:$0xff] %v4238_v56  ;;  %v4242_v0 = vadd.f32 %v526_v62, %v228_v38  ;;  %v3711_v3 = vpop.eup %3710 }
 0x182   :  { %4648 = vst [vmem:[#allocation26_spill] sm:$0xff] %v4240_v60  ;;  %v855_v2 = vmul.f32 0.5, %v3711_v3  ;;  %v4299_v3 = vld [vmem:[#allocation11 + $0x80] ss:$16 sps:$4 sm:$0xff]  }
 0x183   :  { %4649 = vst [vmem:[#allocation27_spill] sm:$0xff] %v4242_v0 }
 0x185   :  { %v530_v7 = vpop.f32.mrb[28].mxu1 }
 0x186   :  { %v4244_v9 = vadd.f32 %v530_v7, %v224_v33  ;;  %v532_v11 = vpop.f32.mrb[29].mxu1  ;;  %v859_v7 = vmul.f32 0.5, %v3709_v58  ;;  %v4293_v58 = vld [vmem:[#allocation11 + $0x60] ss:$16 sps:$4 sm:$0xff]  }
 0x187   :  { %v4246_v13 = vadd.f32 %v532_v11, %v228_v38  ;;  %v534_v14 = vpop.f32.mrb[30].mxu1 }
 0x188   :  { %4650 = vst [vmem:[#allocation28_spill] sm:$0xff] %v4244_v9  ;;  %v4248_v39 = vadd.f32 %v534_v14, %v224_v33  ;;  %v536_v41 = vpop.f32.mrb[31].mxu1  ;;  %v860_v5 = vadd.f32 0.5, %v859_v7  ;;  %v856_v14 = vadd.f32 0.5, %v855_v2  ;;  %v4273_v2 = vld [vmem:[#allocation11 + $0x4] ss:$16 sps:$4 sm:$0xff]  }
 0x189   :  { %4651 = vst [vmem:[#allocation29_spill] sm:$0xff] %v4246_v13  ;;  %v4250_v43 = vadd.f32 %v536_v41, %v228_v38  ;;  %1374 = vmatprep.subr.bf16.mxu0 %v4273_v2  ;;  %v4303_v7 = vld [vmem:[#allocation11 + $0xa4] ss:$16 sps:$4 sm:$0xff]  }
 0x18a   :  { %4652 = vst [vmem:[#allocation30_spill] sm:$0xff] %v4248_v39  ;;  %v866_v41 = vmul.f32 0.0, %v860_v5  ;;  %v4309_v5 = vld [vmem:[#allocation11 + $0xc4] ss:$16 sps:$4 sm:$0xff]  }
 0x18b   :  { %4653 = vst [vmem:[#allocation31_spill] sm:$0xff] %v4250_v43 }
 0x18d   :  { %v842_v32 = vpop.f32.mrb[32].mxu1 }
 0x18e   :  { %v851_v52 = vadd.f32 %v842_v32, %v501_v36  ;;  %v844_v49 = vpop.f32.mrb[33].mxu1 }
 0x18f   :  { %v852_v45 = vadd.f32 %v844_v49, %v503_v37  ;;  %v846_v54 = vpop.f32.mrb[34].mxu1  ;;  %v4281_v49 = vld [vmem:[#allocation11 + $0x20] ss:$16 sps:$4 sm:$0xff]  }
 0x190   :  { %3712 = vtanh.f32 %v851_v52  ;;  %v847_v62 = vpop.f32.mrb[35].mxu1  ;;  %v4654_v52 = vmov 0   ;;  %v4287_v54 = vld [vmem:[#allocation11 + $0x40] ss:$16 sps:$4 sm:$0xff]  }
 0x191   :  { %v862_v11 = vmul.f32 0.5, %v852_v45  ;;  %v4285_v45 = vld [vmem:[#allocation11 + $0x44] ss:$16 sps:$4 sm:$0xff]  }
 0x192   :  { %v4297_v62 = vld [vmem:[#allocation11 + $0x84] ss:$16 sps:$4 sm:$0xff]  }
 0x193   :  { %3714 = vtanh.f32 %v862_v11  ;;  %v4305_v11 = vld [vmem:[#allocation11 + $0xa0] ss:$16 sps:$4 sm:$0xff]  }
 0x19a   :  { %v3713_v12 = vpop.eup %3712 }
 0x19b   :  { %v867_v43 = vmul.f32 %v3713_v12, %v856_v14  ;;  %v4275_v12 = vld [vmem:[#allocation11] ss:$16 sps:$4 sm:$0xff]  }
 0x19c   :  { %v4311_v14 = vld [vmem:[#allocation11 + $0xc0] ss:$16 sps:$4 sm:$0xff]  }
 0x19d   :  { %v4252_v31 = vadd.f32 %v867_v43, %v866_v41  ;;  %v3715_v33 = vpop.eup %3714  ;;  %v4279_v43 = vld [vmem:[#allocation11 + $0x24] ss:$16 sps:$4 sm:$0xff]  }
 0x19e   :  { %v864_v35 = vmul.f32 0.5, %v3715_v33  ;;  %v4315_v41 = vld [vmem:[#allocation11 + $0xe4] ss:$16 sps:$4 sm:$0xff]   ;;  %v4317_v33 = vld [vmem:[#allocation11 + $0xe0] ss:$16 sps:$4 sm:$0xff]  }
 0x19f   :  { %3716 = vtanh.f32 %v4252_v31 }
 0x1a0   :  { %v865_v38 = vadd.f32 0.5, %v864_v35 }
 0x1a9   :  { %v3717_v36 = vpop.eup %3716 }
 0x1aa   :  { %v870_v37 = vmul.f32 %v3717_v36, %v865_v38 }
 0x1ac   :  { %v871_v32 = vpack.c.bf16 %v870_v37, %v870_v37 }
 0x1ae   :  { %872 = vst [vmem:[#allocation4] sm:$0xf] %v871_v32  ;;  %1102 = vmatmul.mubr.bf16.vlgmr.msra.gmra.mrb[4].mxu0 %v871_v32  ;;  %1143 = vmatmul.mubr.bf16.vlgmr.msra.gmra.mrb[36].mxu1 %v871_v32 }
 0x1af   :  { %1416 = vmatpush1.bf16.msra.mxu1 %v4119_v16  ;;  %1406 = vmatprep.mubr.bf16.mxu0 %v4654_v52 }
 0x1b0   :  { %1417 = vmatprep.subr.bf16.mxu1 %v4122_v17  ;;  %1447 = vmatprep.mubr.bf16.mxu1 %v4654_v52 }
 0x1b1   :  { %1375 = vmatpush1.bf16.msra.mxu0 %v4275_v12 }
 0x1b2   :  { %1376 = vmatprep.subr.bf16.mxu0 %v4279_v43 }
 0x1b3   :  { %1418 = vmatpush1.bf16.msra.mxu1 %v4126_v18 }
 0x1b4   :  { %1419 = vmatprep.subr.bf16.mxu1 %v4130_v19 }
 0x1b5   :  { %1377 = vmatpush1.bf16.msra.mxu0 %v4281_v49 }
 0x1b6   :  { %1378 = vmatprep.subr.bf16.mxu0 %v4285_v45 }
 0x1b7   :  { %1420 = vmatpush1.bf16.msra.mxu1 %v4135_v20 }
 0x1b8   :  { %1421 = vmatprep.subr.bf16.mxu1 %v4137_v21 }
 0x1b9   :  { %1379 = vmatpush1.bf16.msra.mxu0 %v4287_v54 }
 0x1bb   :  { %1422 = vmatpush1.bf16.msra.mxu1 %v4143_v22 }
 0x1bc   :  { %1423 = vmatprep.subr.bf16.mxu1 %v4147_v23 }
 0x1bf   :  { %1424 = vmatpush1.bf16.msra.mxu1 %v4150_v24 }
 0x1c0   :  { %1425 = vmatprep.subr.bf16.mxu1 %v4153_v25 }
 0x1c3   :  { %1426 = vmatpush1.bf16.msra.mxu1 %v4156_v26 }
 0x1c4   :  { %1427 = vmatprep.subr.bf16.mxu1 %v4160_v27 }
 0x1c7   :  { %1428 = vmatpush1.bf16.msra.mxu1 %v4163_v28 }
 0x1c8   :  { %1429 = vmatprep.subr.bf16.mxu1 %v4166_v29 }
 0x1cb   :  { %1430 = vmatpush1.bf16.msra.mxu1 %v4169_v30 }
 0x1cc   :  { %1717 = vmatprep.subr.bf16.mxu1 %v4115_v15  ;;  %v4291_v15 = vld [vmem:[#allocation11 + $0x64] ss:$16 sps:$4 sm:$0xff]  }
 0x1cd   :  { %1380 = vmatprep.subr.bf16.mxu0 %v4291_v15 }
 0x1ce   :  { %1381 = vmatpush1.bf16.msra.mxu0 %v4293_v58 }
 0x1cf   :  { %1382 = vmatprep.subr.bf16.mxu0 %v4297_v62 }
 0x1d2   :  { %1383 = vmatpush1.bf16.msra.mxu0 %v4299_v3 }
 0x1d3   :  { %1384 = vmatprep.subr.bf16.mxu0 %v4303_v7 }
 0x1d6   :  { %1385 = vmatpush1.bf16.msra.mxu0 %v4305_v11 }
 0x1d7   :  { %1386 = vmatprep.subr.bf16.mxu0 %v4309_v5 }
 0x1da   :  { %1387 = vmatpush1.bf16.msra.mxu0 %v4311_v14 }
 0x1db   :  { %1388 = vmatprep.subr.bf16.mxu0 %v4315_v41 }
 0x1de   :  { %1389 = vmatpush1.bf16.msra.mxu0 %v4317_v33 }
 0x1df   :  { %1676 = vmatprep.subr.bf16.mxu0 %v4273_v2 }
 0x281   :  { %v1103_v35 = vpop.f32.mrb[4].mxu0  ;;  %v1144_v38 = vpop.f32.mrb[36].mxu1 }
 0x282   :  { %v1151_v36 = vadd.f32 %v1103_v35, %v4196_v44  ;;  %v1153_v37 = vadd.f32 %v1144_v38, %v4224_v40  ;;  %v1105_v32 = vpop.f32.mrb[5].mxu0  ;;  %v1146_v39 = vpop.f32.mrb[37].mxu1 }
 0x283   :  { %v1152_v10 = vadd.f32 %v1105_v32, %v4198_v48  ;;  %v1154_v13 = vadd.f32 %v1146_v39, %v4226_v42  ;;  %v1107_v8 = vpop.f32.mrb[6].mxu0  ;;  %v1148_v9 = vpop.f32.mrb[38].mxu1 }
 0x284   :  { %v1155_v6 = vmul.f32 0.5, %v1151_v36  ;;  %v1108_v0 = vpop.f32.mrb[7].mxu0  ;;  %v1149_v4 = vpop.f32.mrb[39].mxu1 }
 0x285   :  { %v1159_v60 = vmul.f32 0.5, %v1152_v10  ;;  %v1164_v1 = vmul.f32 0.5, %v1154_v13 }
 0x286   :  { %3718 = vtanh.f32 %v1155_v6 }
 0x287   :  { %3720 = vtanh.f32 %v1159_v60 }
 0x288   :  { %3722 = vtanh.f32 %v1153_v37 }
 0x289   :  { %3724 = vtanh.f32 %v1164_v1 }
 0x290   :  { %v3719_v56 = vpop.eup %3718 }
 0x291   :  { %v3721_v44 = vpop.eup %3720  ;;  %v1157_v35 = vmul.f32 0.5, %v3719_v56 }
 0x292   :  { %v1161_v40 = vmul.f32 0.5, %v3721_v44  ;;  %v3723_v63 = vpop.eup %3722 }
 0x293   :  { %v1158_v38 = vadd.f32 0.5, %v1157_v35  ;;  %v3725_v4 = vpop.eup %3724 }
 0x294   :  { %v1162_v48 = vadd.f32 0.5, %v1161_v40  ;;  %v1166_v6 = vmul.f32 0.5, %v3725_v4  ;;  %v4397_v4 = vld [vmem:[#allocation11 + $0x28] ss:$16 sps:$4 sm:$0xff]  }
 0x295   :  { %v1169_v32 = vmul.f32 %v3723_v63, %v1158_v38 }
 0x296   :  { %v1168_v8 = vmul.f32 %v1162_v48, %v4252_v31  ;;  %v1167_v10 = vadd.f32 0.5, %v1166_v6  ;;  %v4401_v6 = vld [vmem:[#allocation11 + $0x4c] ss:$16 sps:$4 sm:$0xff]  }
 0x298   :  { %v4327_v42 = vadd.f32 %v1169_v32, %v1168_v8  ;;  %v4389_v32 = vld [vmem:[#allocation11 + $0xc] ss:$16 sps:$4 sm:$0xff]   ;;  %v4391_v8 = vld [vmem:[#allocation11 + $0x8] ss:$16 sps:$4 sm:$0xff]  }
 0x29a   :  { %3726 = vtanh.f32 %v4327_v42 }
 0x2a4   :  { %v3727_v60 = vpop.eup %3726 }
 0x2a5   :  { %v1172_v0 = vmul.f32 %v3727_v60, %v1167_v10  ;;  %v4403_v10 = vld [vmem:[#allocation11 + $0x48] ss:$16 sps:$4 sm:$0xff]  }
 0x2a6   :  { %v4409_v60 = vld [vmem:[#allocation11 + $0x68] ss:$16 sps:$4 sm:$0xff]  }
 0x2a7   :  { %v1173_v9 = vpack.c.bf16 %v1172_v0, %v1172_v0  ;;  %v4413_v0 = vld [vmem:[#allocation11 + $0x8c] ss:$16 sps:$4 sm:$0xff]  }
 0x2a9   :  { %v1175_v13 = vrot.slane %v1173_v9, 4  ;;  %1407 = vmatmul.mubr.bf16.vlgmr.msra.gmra.mrb[8].mxu0 %v1173_v9  ;;  %1448 = vmatmul.mubr.bf16.vlgmr.msra.gmra.mrb[40].mxu1 %v1173_v9  ;;  %v4415_v9 = vld [vmem:[#allocation11 + $0x88] ss:$16 sps:$4 sm:$0xff]  }
 0x2aa   :  { %1677 = vmatpush1.bf16.msra.mxu0 %v4275_v12  ;;  %1718 = vmatpush1.bf16.msra.mxu1 %v4119_v16 }
 0x2ab   :  { %1177 = vst [vmem:[#allocation4] sm:$0xf0] %v1175_v13  ;;  %1678 = vmatprep.subr.bf16.mxu0 %v4279_v43  ;;  %1719 = vmatprep.subr.bf16.mxu1 %v4122_v17  ;;  %v4419_v13 = vld [vmem:[#allocation11 + $0xac] ss:$16 sps:$4 sm:$0xff]  }
 0x2ac   :  { %1708 = vmatprep.mubr.bf16.mxu0 %v4654_v52  ;;  %1749 = vmatprep.mubr.bf16.mxu1 %v4654_v52 }
 0x2ae   :  { %1679 = vmatpush1.bf16.msra.mxu0 %v4281_v49  ;;  %1720 = vmatpush1.bf16.msra.mxu1 %v4126_v18 }
 0x2af   :  { %1680 = vmatprep.subr.bf16.mxu0 %v4285_v45  ;;  %1721 = vmatprep.subr.bf16.mxu1 %v4130_v19 }
 0x2b2   :  { %1681 = vmatpush1.bf16.msra.mxu0 %v4287_v54  ;;  %1722 = vmatpush1.bf16.msra.mxu1 %v4135_v20 }
 0x2b3   :  { %1682 = vmatprep.subr.bf16.mxu0 %v4291_v15  ;;  %1723 = vmatprep.subr.bf16.mxu1 %v4137_v21 }
 0x2b6   :  { %1683 = vmatpush1.bf16.msra.mxu0 %v4293_v58  ;;  %1724 = vmatpush1.bf16.msra.mxu1 %v4143_v22 }
 0x2b7   :  { %1684 = vmatprep.subr.bf16.mxu0 %v4297_v62  ;;  %1725 = vmatprep.subr.bf16.mxu1 %v4147_v23 }
 0x2ba   :  { %1685 = vmatpush1.bf16.msra.mxu0 %v4299_v3  ;;  %1726 = vmatpush1.bf16.msra.mxu1 %v4150_v24 }
 0x2bb   :  { %1686 = vmatprep.subr.bf16.mxu0 %v4303_v7  ;;  %1727 = vmatprep.subr.bf16.mxu1 %v4153_v25 }
 0x2be   :  { %1687 = vmatpush1.bf16.msra.mxu0 %v4305_v11  ;;  %1728 = vmatpush1.bf16.msra.mxu1 %v4156_v26 }
 0x2bf   :  { %1688 = vmatprep.subr.bf16.mxu0 %v4309_v5  ;;  %1729 = vmatprep.subr.bf16.mxu1 %v4160_v27 }
 0x2c2   :  { %1689 = vmatpush1.bf16.msra.mxu0 %v4311_v14  ;;  %1730 = vmatpush1.bf16.msra.mxu1 %v4163_v28 }
 0x2c3   :  { %1690 = vmatprep.subr.bf16.mxu0 %v4315_v41  ;;  %1731 = vmatprep.subr.bf16.mxu1 %v4166_v29 }
 0x2c6   :  { %1691 = vmatpush1.bf16.msra.mxu0 %v4317_v33  ;;  %1732 = vmatpush1.bf16.msra.mxu1 %v4169_v30 }
 0x2c7   :  { %1981 = vmatprep.subr.bf16.mxu0 %v4273_v2  ;;  %2022 = vmatprep.subr.bf16.mxu1 %v4389_v32 }
 0x37c   :  { %v1408_v16 = vpop.f32.mrb[8].mxu0  ;;  %v1449_v17 = vpop.f32.mrb[40].mxu1 }
 0x37d   :  { %v1456_v18 = vadd.f32 %v1408_v16, %v4200_v53  ;;  %v1458_v19 = vadd.f32 %v1449_v17, %v4228_v46  ;;  %v1410_v20 = vpop.f32.mrb[9].mxu0  ;;  %v1451_v21 = vpop.f32.mrb[41].mxu1  ;;  %v4421_v16 = vld [vmem:[#allocation11 + $0xa8] ss:$16 sps:$4 sm:$0xff]   ;;  %v4425_v17 = vld [vmem:[#allocation11 + $0xcc] ss:$16 sps:$4 sm:$0xff]  }
 0x37e   :  { %v1457_v22 = vadd.f32 %v1410_v20, %v4202_v55  ;;  %v1459_v23 = vadd.f32 %v1451_v21, %v4230_v47  ;;  %v1412_v24 = vpop.f32.mrb[10].mxu0  ;;  %v1453_v25 = vpop.f32.mrb[42].mxu1  ;;  %v4433_v20 = vld [vmem:[#allocation11 + $0xe8] ss:$16 sps:$4 sm:$0xff]  }
 0x37f   :  { %v1460_v26 = vmul.f32 0.5, %v1456_v18  ;;  %v1413_v27 = vpop.f32.mrb[11].mxu0  ;;  %v1454_v28 = vpop.f32.mrb[43].mxu1  ;;  %v4427_v18 = vld [vmem:[#allocation11 + $0xc8] ss:$16 sps:$4 sm:$0xff]  }
 0x380   :  { %v1464_v29 = vmul.f32 0.5, %v1457_v22  ;;  %v1469_v30 = vmul.f32 0.5, %v1459_v23 }
 0x381   :  { %3728 = vtanh.f32 %v1460_v26 }
 0x382   :  { %3730 = vtanh.f32 %v1464_v29 }
 0x383   :  { %3732 = vtanh.f32 %v1458_v19  ;;  %v4431_v19 = vld [vmem:[#allocation11 + $0xec] ss:$16 sps:$4 sm:$0xff]  }
 0x384   :  { %3734 = vtanh.f32 %v1469_v30 }
 0x38b   :  { %v3729_v63 = vpop.eup %3728 }
 0x38c   :  { %v3731_v53 = vpop.eup %3730  ;;  %v1462_v1 = vmul.f32 0.5, %v3729_v63 }
 0x38d   :  { %v1466_v46 = vmul.f32 0.5, %v3731_v53  ;;  %v3733_v39 = vpop.eup %3732 }
 0x38e   :  { %v1463_v56 = vadd.f32 0.5, %v1462_v1  ;;  %v3735_v37 = vpop.eup %3734 }
 0x38f   :  { %v1467_v55 = vadd.f32 0.5, %v1466_v46  ;;  %v1471_v44 = vmul.f32 0.5, %v3735_v37 }
 0x390   :  { %v1474_v31 = vmul.f32 %v3733_v39, %v1463_v56 }
 0x391   :  { %v1473_v47 = vmul.f32 %v1467_v55, %v4327_v42  ;;  %v1472_v35 = vadd.f32 0.5, %v1471_v44  ;;  %v4395_v42 = vld [vmem:[#allocation11 + $0x2c] ss:$16 sps:$4 sm:$0xff]  }
 0x393   :  { %v4368_v36 = vadd.f32 %v1474_v31, %v1473_v47 }
 0x395   :  { %3736 = vtanh.f32 %v4368_v36 }
 0x39f   :  { %v3737_v40 = vpop.eup %3736 }
 0x3a0   :  { %v1477_v38 = vmul.f32 %v3737_v40, %v1472_v35 }
 0x3a2   :  { %v1478_v48 = vpack.c.bf16 %v1477_v38, %v1477_v38 }
 0x3a4   :  { %1479 = vst [vmem:[#allocation4 + $0x8] sm:$0xf] %v1478_v48  ;;  %1709 = vmatmul.mubr.bf16.vlgmr.msra.gmra.mrb[12].mxu0 %v1478_v48  ;;  %1750 = vmatmul.mubr.bf16.vlgmr.msra.gmra.mrb[44].mxu1 %v1478_v48 }
 0x3a5   :  { %1982 = vmatpush1.bf16.msra.mxu0 %v4275_v12  ;;  %2013 = vmatprep.mubr.bf16.mxu0 %v4654_v52 }
 0x3a6   :  { %1983 = vmatprep.subr.bf16.mxu0 %v4279_v43  ;;  %2054 = vmatprep.mubr.bf16.mxu1 %v4654_v52 }
 0x3a7   :  { %2023 = vmatpush1.bf16.msra.mxu1 %v4391_v8 }
 0x3a8   :  { %2024 = vmatprep.subr.bf16.mxu1 %v4395_v42 }
 0x3a9   :  { %1984 = vmatpush1.bf16.msra.mxu0 %v4281_v49 }
 0x3aa   :  { %1985 = vmatprep.subr.bf16.mxu0 %v4285_v45 }
 0x3ab   :  { %2025 = vmatpush1.bf16.msra.mxu1 %v4397_v4 }
 0x3ac   :  { %2026 = vmatprep.subr.bf16.mxu1 %v4401_v6 }
 0x3ad   :  { %1986 = vmatpush1.bf16.msra.mxu0 %v4287_v54 }
 0x3ae   :  { %1987 = vmatprep.subr.bf16.mxu0 %v4291_v15 }
 0x3af   :  { %2027 = vmatpush1.bf16.msra.mxu1 %v4403_v10 }
 0x3b1   :  { %1988 = vmatpush1.bf16.msra.mxu0 %v4293_v58 }
 0x3b2   :  { %1989 = vmatprep.subr.bf16.mxu0 %v4297_v62 }
 0x3b5   :  { %1990 = vmatpush1.bf16.msra.mxu0 %v4299_v3 }
 0x3b6   :  { %1991 = vmatprep.subr.bf16.mxu0 %v4303_v7 }
 0x3b9   :  { %1992 = vmatpush1.bf16.msra.mxu0 %v4305_v11 }
 0x3ba   :  { %1993 = vmatprep.subr.bf16.mxu0 %v4309_v5 }
 0x3bd   :  { %1994 = vmatpush1.bf16.msra.mxu0 %v4311_v14 }
 0x3be   :  { %1995 = vmatprep.subr.bf16.mxu0 %v4315_v41 }
 0x3c1   :  { %1996 = vmatpush1.bf16.msra.mxu0 %v4317_v33 }
 0x3c2   :  { %2283 = vmatprep.subr.bf16.mxu0 %v4273_v2  ;;  %v4407_v2 = vld [vmem:[#allocation11 + $0x6c] ss:$16 sps:$4 sm:$0xff]  }
 0x3c3   :  { %2028 = vmatprep.subr.bf16.mxu1 %v4407_v2 }
 0x3c4   :  { %2029 = vmatpush1.bf16.msra.mxu1 %v4409_v60 }
 0x3c5   :  { %2030 = vmatprep.subr.bf16.mxu1 %v4413_v0 }
 0x3c8   :  { %2031 = vmatpush1.bf16.msra.mxu1 %v4415_v9 }
 0x3c9   :  { %2032 = vmatprep.subr.bf16.mxu1 %v4419_v13 }
 0x3cc   :  { %2033 = vmatpush1.bf16.msra.mxu1 %v4421_v16 }
 0x3cd   :  { %2034 = vmatprep.subr.bf16.mxu1 %v4425_v17 }
 0x3d0   :  { %2035 = vmatpush1.bf16.msra.mxu1 %v4427_v18 }
 0x3d1   :  { %2036 = vmatprep.subr.bf16.mxu1 %v4431_v19 }
 0x3d4   :  { %2037 = vmatpush1.bf16.msra.mxu1 %v4433_v20 }
 0x3d5   :  { %2324 = vmatprep.subr.bf16.mxu1 %v4389_v32 }
 0x477   :  { %v1710_v21 = vpop.f32.mrb[12].mxu0  ;;  %v1751_v22 = vpop.f32.mrb[44].mxu1 }
 0x478   :  { %v1758_v23 = vadd.f32 %v1710_v21, %v4204_v57  ;;  %v1760_v24 = vadd.f32 %v1751_v22, %v4232_v50  ;;  %v1712_v25 = vpop.f32.mrb[13].mxu0  ;;  %v1753_v26 = vpop.f32.mrb[45].mxu1 }
 0x479   :  { %v1759_v27 = vadd.f32 %v1712_v25, %v4206_v59  ;;  %v1761_v28 = vadd.f32 %v1753_v26, %v4234_v51  ;;  %v1714_v29 = vpop.f32.mrb[14].mxu0  ;;  %v1755_v30 = vpop.f32.mrb[46].mxu1 }
 0x47a   :  { %v1762_v63 = vmul.f32 0.5, %v1758_v23  ;;  %v1715_v53 = vpop.f32.mrb[15].mxu0  ;;  %v1756_v1 = vpop.f32.mrb[47].mxu1 }
 0x47b   :  { %v1766_v46 = vmul.f32 0.5, %v1759_v27  ;;  %v1771_v56 = vmul.f32 0.5, %v1761_v28 }
 0x47c   :  { %3738 = vtanh.f32 %v1762_v63 }
 0x47d   :  { %3740 = vtanh.f32 %v1766_v46 }
 0x47e   :  { %3742 = vtanh.f32 %v1760_v24 }
 0x47f   :  { %3744 = vtanh.f32 %v1771_v56 }
 0x486   :  { %v3739_v39 = vpop.eup %3738 }
 0x487   :  { %v3741_v57 = vpop.eup %3740  ;;  %v1764_v55 = vmul.f32 0.5, %v3739_v39 }
 0x488   :  { %v1768_v50 = vmul.f32 0.5, %v3741_v57  ;;  %v3743_v47 = vpop.eup %3742 }
 0x489   :  { %v1765_v31 = vadd.f32 0.5, %v1764_v55  ;;  %v3745_v35 = vpop.eup %3744 }
 0x48a   :  { %v1769_v59 = vadd.f32 0.5, %v1768_v50  ;;  %v1773_v40 = vmul.f32 0.5, %v3745_v35  ;;  %v3678_v50 = vld [vmem:[#allocation11 + $0x4] ss:$16 sps:$4 sm:$0xff]  }
 0x48b   :  { %v1776_v37 = vmul.f32 %v3743_v47, %v1765_v31  ;;  %v4505_v31 = vld [vmem:[#allocation11] ss:$16 sps:$4 sm:$0xff]   ;;  %v4508_v47 = vld [vmem:[#allocation11 + $0x24] ss:$16 sps:$4 sm:$0xff]  }
 0x48c   :  { %v1775_v51 = vmul.f32 %v1769_v59, %v4368_v36  ;;  %v1774_v38 = vadd.f32 0.5, %v1773_v40  ;;  %v4510_v59 = vld [vmem:[#allocation11 + $0x20] ss:$16 sps:$4 sm:$0xff]   ;;  %v4526_v35 = vld [vmem:[#allocation11 + $0x84] ss:$16 sps:$4 sm:$0xff]  }
 0x48d   :  { %v4528_v40 = vld [vmem:[#allocation11 + $0x80] ss:$16 sps:$4 sm:$0xff]  }
 0x48e   :  { %v4443_v44 = vadd.f32 %v1776_v37, %v1775_v51  ;;  %v4514_v37 = vld [vmem:[#allocation11 + $0x44] ss:$16 sps:$4 sm:$0xff]   ;;  %v4516_v51 = vld [vmem:[#allocation11 + $0x40] ss:$16 sps:$4 sm:$0xff]  }
 0x490   :  { %3746 = vtanh.f32 %v4443_v44 }
 0x49a   :  { %v3747_v48 = vpop.eup %3746 }
 0x49b   :  { %v1779_v21 = vmul.f32 %v3747_v48, %v1774_v38  ;;  %v4532_v38 = vld [vmem:[#allocation11 + $0xa4] ss:$16 sps:$4 sm:$0xff]   ;;  %v4534_v48 = vld [vmem:[#allocation11 + $0xa0] ss:$16 sps:$4 sm:$0xff]  }
 0x49d   :  { %v1780_v22 = vpack.c.bf16 %v1779_v21, %v1779_v21  ;;  %v4538_v21 = vld [vmem:[#allocation11 + $0xc4] ss:$16 sps:$4 sm:$0xff]  }
 0x49f   :  { %v1782_v23 = vrot.slane %v1780_v22, 4  ;;  %2014 = vmatmul.mubr.bf16.vlgmr.msra.gmra.mrb[16].mxu0 %v1780_v22  ;;  %2055 = vmatmul.mubr.bf16.vlgmr.msra.gmra.mrb[48].mxu1 %v1780_v22  ;;  %v4540_v22 = vld [vmem:[#allocation11 + $0xc0] ss:$16 sps:$4 sm:$0xff]  }
 0x4a0   :  { %2284 = vmatpush1.bf16.msra.mxu0 %v4275_v12  ;;  %2325 = vmatpush1.bf16.msra.mxu1 %v4391_v8 }
 0x4a1   :  { %1784 = vst [vmem:[#allocation4 + $0x8] sm:$0xf0] %v1782_v23  ;;  %2285 = vmatprep.subr.bf16.mxu0 %v4279_v43  ;;  %2326 = vmatprep.subr.bf16.mxu1 %v4395_v42  ;;  %v4544_v23 = vld [vmem:[#allocation11 + $0xe4] ss:$16 sps:$4 sm:$0xff]  }
 0x4a2   :  { %2315 = vmatprep.mubr.bf16.mxu0 %v4654_v52  ;;  %2356 = vmatprep.mubr.bf16.mxu1 %v4654_v52 }
 0x4a4   :  { %2286 = vmatpush1.bf16.msra.mxu0 %v4281_v49  ;;  %2327 = vmatpush1.bf16.msra.mxu1 %v4397_v4 }
 0x4a5   :  { %2287 = vmatprep.subr.bf16.mxu0 %v4285_v45  ;;  %2328 = vmatprep.subr.bf16.mxu1 %v4401_v6 }
 0x4a8   :  { %2288 = vmatpush1.bf16.msra.mxu0 %v4287_v54  ;;  %2329 = vmatpush1.bf16.msra.mxu1 %v4403_v10 }
 0x4a9   :  { %2289 = vmatprep.subr.bf16.mxu0 %v4291_v15  ;;  %2330 = vmatprep.subr.bf16.mxu1 %v4407_v2 }
 0x4ac   :  { %2290 = vmatpush1.bf16.msra.mxu0 %v4293_v58  ;;  %2331 = vmatpush1.bf16.msra.mxu1 %v4409_v60  ;;  %v4655_v58 = vld [vmem:[#allocation18_spill] sm:$0xff] }
 0x4ad   :  { %2291 = vmatprep.subr.bf16.mxu0 %v4297_v62  ;;  %2332 = vmatprep.subr.bf16.mxu1 %v4413_v0 }
 0x4b0   :  { %2292 = vmatpush1.bf16.msra.mxu0 %v4299_v3  ;;  %2333 = vmatpush1.bf16.msra.mxu1 %v4415_v9  ;;  %v4656_v3 = vld [vmem:[#allocation25_spill] sm:$0xff] }
 0x4b1   :  { %2293 = vmatprep.subr.bf16.mxu0 %v4303_v7  ;;  %2334 = vmatprep.subr.bf16.mxu1 %v4419_v13 }
 0x4b4   :  { %2294 = vmatpush1.bf16.msra.mxu0 %v4305_v11  ;;  %2335 = vmatpush1.bf16.msra.mxu1 %v4421_v16 }
 0x4b5   :  { %2295 = vmatprep.subr.bf16.mxu0 %v4309_v5  ;;  %2336 = vmatprep.subr.bf16.mxu1 %v4425_v17 }
 0x4b8   :  { %2296 = vmatpush1.bf16.msra.mxu0 %v4311_v14  ;;  %2337 = vmatpush1.bf16.msra.mxu1 %v4427_v18 }
 0x4b9   :  { %2297 = vmatprep.subr.bf16.mxu0 %v4315_v41  ;;  %2338 = vmatprep.subr.bf16.mxu1 %v4431_v19 }
 0x4bc   :  { %2298 = vmatpush1.bf16.msra.mxu0 %v4317_v33  ;;  %2339 = vmatpush1.bf16.msra.mxu1 %v4433_v20 }
 0x4bd   :  { %2629 = vmatprep.subr.bf16.mxu1 %v4389_v32  ;;  %2588 = vmatprep.subr.bf16.mxu0 %v3678_v50 }
 0x572   :  { %v2015_v12 = vpop.f32.mrb[16].mxu0  ;;  %v2056_v43 = vpop.f32.mrb[48].mxu1 }
 0x573   :  { %v2063_v49 = vadd.f32 %v2015_v12, %v4208_v61  ;;  %v2065_v45 = vadd.f32 %v2056_v43, %v4236_v34  ;;  %v2017_v54 = vpop.f32.mrb[17].mxu0  ;;  %v2058_v15 = vpop.f32.mrb[49].mxu1  ;;  %v4546_v12 = vld [vmem:[#allocation11 + $0xe0] ss:$16 sps:$4 sm:$0xff]  }
 0x574   :  { %v2064_v62 = vadd.f32 %v2017_v54, %v4655_v58  ;;  %v2066_v7 = vadd.f32 %v2058_v15, %v4656_v3  ;;  %v2019_v11 = vpop.f32.mrb[18].mxu0  ;;  %v2060_v5 = vpop.f32.mrb[50].mxu1  ;;  %v4658_v15 = vld [vmem:[#allocation26_spill] sm:$0xff] }
 0x575   :  { %v2067_v14 = vmul.f32 0.5, %v2063_v49  ;;  %v2020_v41 = vpop.f32.mrb[19].mxu0  ;;  %v2061_v33 = vpop.f32.mrb[51].mxu1  ;;  %v4660_v5 = vld [vmem:[#allocation27_spill] sm:$0xff] }
 0x576   :  { %v2071_v36 = vmul.f32 0.5, %v2064_v62  ;;  %v2076_v24 = vmul.f32 0.5, %v2066_v7  ;;  %v4659_v7 = vld [vmem:[#allocation20_spill] sm:$0xff] }
 0x577   :  { %3748 = vtanh.f32 %v2067_v14 }
 0x578   :  { %3750 = vtanh.f32 %v2071_v36 }
 0x579   :  { %3752 = vtanh.f32 %v2065_v45  ;;  %v4657_v45 = vld [vmem:[#allocation19_spill] sm:$0xff] }
 0x57a   :  { %3754 = vtanh.f32 %v2076_v24 }
 0x581   :  { %v3749_v25 = vpop.eup %3748 }
 0x582   :  { %v3751_v61 = vpop.eup %3750  ;;  %v2069_v26 = vmul.f32 0.5, %v3749_v25 }
 0x583   :  { %v2073_v34 = vmul.f32 0.5, %v3751_v61  ;;  %v3753_v28 = vpop.eup %3752 }
 0x584   :  { %v2070_v27 = vadd.f32 0.5, %v2069_v26  ;;  %v3755_v1 = vpop.eup %3754 }
 0x585   :  { %v2074_v29 = vadd.f32 0.5, %v2073_v34  ;;  %v2078_v46 = vmul.f32 0.5, %v3755_v1 }
 0x586   :  { %v2081_v30 = vmul.f32 %v3753_v28, %v2070_v27 }
 0x587   :  { %v2080_v63 = vmul.f32 %v2074_v29, %v4443_v44  ;;  %v2079_v56 = vadd.f32 0.5, %v2078_v46  ;;  %v4522_v44 = vld [vmem:[#allocation11 + $0x60] ss:$16 sps:$4 sm:$0xff]  }
 0x589   :  { %v4484_v53 = vadd.f32 %v2081_v30, %v2080_v63 }
 0x58b   :  { %3756 = vtanh.f32 %v4484_v53 }
 0x595   :  { %v3757_v39 = vpop.eup %3756 }
 0x596   :  { %v2084_v57 = vmul.f32 %v3757_v39, %v2079_v56 }
 0x598   :  { %v2085_v55 = vpack.c.bf16 %v2084_v57, %v2084_v57 }
 0x59a   :  { %2086 = vst [vmem:[#allocation4 + $0x10] sm:$0xf] %v2085_v55  ;;  %2316 = vmatmul.mubr.bf16.vlgmr.msra.gmra.mrb[20].mxu0 %v2085_v55  ;;  %2357 = vmatmul.mubr.bf16.vlgmr.msra.gmra.mrb[52].mxu1 %v2085_v55 }
 0x59b   :  { %2630 = vmatpush1.bf16.msra.mxu1 %v4391_v8  ;;  %2620 = vmatprep.mubr.bf16.mxu0 %v4654_v52 }
 0x59c   :  { %2631 = vmatprep.subr.bf16.mxu1 %v4395_v42  ;;  %2661 = vmatprep.mubr.bf16.mxu1 %v4654_v52 }
 0x59d   :  { %2589 = vmatpush1.bf16.msra.mxu0 %v4505_v31 }
 0x59e   :  { %2590 = vmatprep.subr.bf16.mxu0 %v4508_v47 }
 0x59f   :  { %2632 = vmatpush1.bf16.msra.mxu1 %v4397_v4 }
 0x5a0   :  { %2633 = vmatprep.subr.bf16.mxu1 %v4401_v6 }
 0x5a1   :  { %2591 = vmatpush1.bf16.msra.mxu0 %v4510_v59 }
 0x5a2   :  { %2592 = vmatprep.subr.bf16.mxu0 %v4514_v37 }
 0x5a3   :  { %2634 = vmatpush1.bf16.msra.mxu1 %v4403_v10 }
 0x5a4   :  { %2635 = vmatprep.subr.bf16.mxu1 %v4407_v2 }
 0x5a5   :  { %2593 = vmatpush1.bf16.msra.mxu0 %v4516_v51 }
 0x5a7   :  { %2636 = vmatpush1.bf16.msra.mxu1 %v4409_v60 }
 0x5a8   :  { %2637 = vmatprep.subr.bf16.mxu1 %v4413_v0 }
 0x5ab   :  { %2638 = vmatpush1.bf16.msra.mxu1 %v4415_v9 }
 0x5ac   :  { %2639 = vmatprep.subr.bf16.mxu1 %v4419_v13 }
 0x5af   :  { %2640 = vmatpush1.bf16.msra.mxu1 %v4421_v16 }
 0x5b0   :  { %2641 = vmatprep.subr.bf16.mxu1 %v4425_v17 }
 0x5b3   :  { %2642 = vmatpush1.bf16.msra.mxu1 %v4427_v18 }
 0x5b4   :  { %2643 = vmatprep.subr.bf16.mxu1 %v4431_v19 }
 0x5b7   :  { %2644 = vmatpush1.bf16.msra.mxu1 %v4433_v20 }
 0x5b8   :  { %2931 = vmatprep.subr.bf16.mxu1 %v4389_v32  ;;  %v4520_v32 = vld [vmem:[#allocation11 + $0x64] ss:$16 sps:$4 sm:$0xff]  }
 0x5b9   :  { %2594 = vmatprep.subr.bf16.mxu0 %v4520_v32 }
 0x5ba   :  { %2595 = vmatpush1.bf16.msra.mxu0 %v4522_v44 }
 0x5bb   :  { %2596 = vmatprep.subr.bf16.mxu0 %v4526_v35 }
 0x5be   :  { %2597 = vmatpush1.bf16.msra.mxu0 %v4528_v40 }
 0x5bf   :  { %2598 = vmatprep.subr.bf16.mxu0 %v4532_v38 }
 0x5c2   :  { %2599 = vmatpush1.bf16.msra.mxu0 %v4534_v48 }
 0x5c3   :  { %2600 = vmatprep.subr.bf16.mxu0 %v4538_v21 }
 0x5c6   :  { %2601 = vmatpush1.bf16.msra.mxu0 %v4540_v22 }
 0x5c7   :  { %2602 = vmatprep.subr.bf16.mxu0 %v4544_v23 }
 0x5ca   :  { %2603 = vmatpush1.bf16.msra.mxu0 %v4546_v12 }
 0x5cb   :  { %2890 = vmatprep.subr.bf16.mxu0 %v3678_v50 }
 0x66d   :  { %v2317_v43 = vpop.f32.mrb[20].mxu0  ;;  %v2358_v49 = vpop.f32.mrb[52].mxu1 }
 0x66e   :  { %v2365_v54 = vadd.f32 %v2317_v43, %v4657_v45  ;;  %v2367_v58 = vadd.f32 %v2358_v49, %v4658_v15  ;;  %v2319_v62 = vpop.f32.mrb[21].mxu0  ;;  %v2360_v3 = vpop.f32.mrb[53].mxu1 }
 0x66f   :  { %v2366_v11 = vadd.f32 %v2319_v62, %v4659_v7  ;;  %v2368_v14 = vadd.f32 %v2360_v3, %v4660_v5  ;;  %v2321_v41 = vpop.f32.mrb[22].mxu0  ;;  %v2362_v33 = vpop.f32.mrb[54].mxu1  ;;  %v3701_v7 = vld [vmem:[#allocation12 + $0x8] sm:$0xff]   ;;  %v3702_v5 = vld [vmem:[#allocation12 + $0x10] sm:$0xff]  }
 0x670   :  { %v2369_v36 = vmul.f32 0.5, %v2365_v54  ;;  %v2322_v24 = vpop.f32.mrb[23].mxu0  ;;  %v2363_v25 = vpop.f32.mrb[55].mxu1  ;;  %v3704_v41 = vld [vmem:[#allocation12 + $0x20] sm:$0xff]   ;;  %v3705_v33 = vld [vmem:[#allocation12 + $0x28] sm:$0xff]  }
 0x671   :  { %v2373_v61 = vmul.f32 0.5, %v2366_v11  ;;  %v2378_v26 = vmul.f32 0.5, %v2368_v14  ;;  %v2999_v11 = vld [vmem:[#allocation4] sm:$0xff]  ;;  %v3703_v14 = vld [vmem:[#allocation12 + $0x18] sm:$0xff]   ;;  %v3000_v25 = vld [vmem:[#allocation4 + $0x8] sm:$0xff] }
 0x672   :  { %3758 = vtanh.f32 %v2369_v36  ;;  %v3706_v36 = vld [vmem:[#allocation12 + $0x30] sm:$0xff]   ;;  %v3707_v24 = vld [vmem:[#allocation12 + $0x38] sm:$0xff]  }
 0x673   :  { %3760 = vtanh.f32 %v2373_v61 }
 0x674   :  { %3762 = vtanh.f32 %v2367_v58 }
 0x675   :  { %3764 = vtanh.f32 %v2378_v26 }
 0x67c   :  { %v3759_v34 = vpop.eup %3758 }
 0x67d   :  { %v3761_v27 = vpop.eup %3760  ;;  %v2371_v28 = vmul.f32 0.5, %v3759_v34 }
 0x67e   :  { %v2375_v29 = vmul.f32 0.5, %v3761_v27  ;;  %v3763_v63 = vpop.eup %3762  ;;  %v4665_v27 = vld [vmem:[#allocation23_spill] sm:$0xff] }
 0x67f   :  { %v2372_v30 = vadd.f32 0.5, %v2371_v28  ;;  %v3765_v57 = vpop.eup %3764 }
 0x680   :  { %v2376_v1 = vadd.f32 0.5, %v2375_v29  ;;  %v2380_v55 = vmul.f32 0.5, %v3765_v57  ;;  %v4666_v29 = vld [vmem:[#allocation30_spill] sm:$0xff] }
 0x681   :  { %v2383_v46 = vmul.f32 %v3763_v63, %v2372_v30 }
 0x682   :  { %v2382_v56 = vmul.f32 %v2376_v1, %v4484_v53  ;;  %v2381_v50 = vadd.f32 0.5, %v2380_v55 }
 0x684   :  { %v4555_v39 = vadd.f32 %v2383_v46, %v2382_v56  ;;  %v4667_v46 = vld [vmem:[#allocation24_spill] sm:$0xff] }
 0x686   :  { %3766 = vtanh.f32 %v4555_v39 }
 0x690   :  { %v3767_v43 = vpop.eup %3766 }
 0x691   :  { %v2386_v49 = vmul.f32 %v3767_v43, %v2381_v50 }
 0x693   :  { %v2387_v45 = vpack.c.bf16 %v2386_v49, %v2386_v49 }
 0x695   :  { %v2389_v54 = vrot.slane %v2387_v45, 4  ;;  %2621 = vmatmul.mubr.bf16.vlgmr.msra.gmra.mrb[24].mxu0 %v2387_v45  ;;  %2662 = vmatmul.mubr.bf16.vlgmr.msra.gmra.mrb[56].mxu1 %v2387_v45 }
 0x696   :  { %2891 = vmatpush1.bf16.msra.mxu0 %v4505_v31  ;;  %2932 = vmatpush1.bf16.msra.mxu1 %v4391_v8 }
 0x697   :  { %2391 = vst [vmem:[#allocation4 + $0x10] sm:$0xf0] %v2389_v54  ;;  %2892 = vmatprep.subr.bf16.mxu0 %v4508_v47  ;;  %2933 = vmatprep.subr.bf16.mxu1 %v4395_v42 }
 0x698   :  { %2922 = vmatprep.mubr.bf16.mxu0 %v4654_v52  ;;  %2963 = vmatprep.mubr.bf16.mxu1 %v4654_v52  ;;  %v3700_v52 = vld [vmem:[#allocation12] sm:$0xff]  }
 0x69a   :  { %2893 = vmatpush1.bf16.msra.mxu0 %v4510_v59  ;;  %2934 = vmatpush1.bf16.msra.mxu1 %v4397_v4  ;;  %v4661_v4 = vld [vmem:[#allocation21_spill] sm:$0xff] }
 0x69b   :  { %2894 = vmatprep.subr.bf16.mxu0 %v4514_v37  ;;  %2935 = vmatprep.subr.bf16.mxu1 %v4401_v6 }
 0x69e   :  { %2895 = vmatpush1.bf16.msra.mxu0 %v4516_v51  ;;  %2936 = vmatpush1.bf16.msra.mxu1 %v4403_v10  ;;  %v4662_v10 = vld [vmem:[#allocation28_spill] sm:$0xff] }
 0x69f   :  { %2896 = vmatprep.subr.bf16.mxu0 %v4520_v32  ;;  %2937 = vmatprep.subr.bf16.mxu1 %v4407_v2  ;;  %v3001_v61 = vld [vmem:[#allocation4 + $0x10] sm:$0xff] }
 0x6a2   :  { %2897 = vmatpush1.bf16.msra.mxu0 %v4522_v44  ;;  %2938 = vmatpush1.bf16.msra.mxu1 %v4409_v60 }
 0x6a3   :  { %2898 = vmatprep.subr.bf16.mxu0 %v4526_v35  ;;  %2939 = vmatprep.subr.bf16.mxu1 %v4413_v0 }
 0x6a6   :  { %2899 = vmatpush1.bf16.msra.mxu0 %v4528_v40  ;;  %2940 = vmatpush1.bf16.msra.mxu1 %v4415_v9  ;;  %v4663_v9 = vld [vmem:[#allocation22_spill] sm:$0xff] }
 0x6a7   :  { %2900 = vmatprep.subr.bf16.mxu0 %v4532_v38  ;;  %2941 = vmatprep.subr.bf16.mxu1 %v4419_v13 }
 0x6aa   :  { %2901 = vmatpush1.bf16.msra.mxu0 %v4534_v48  ;;  %2942 = vmatpush1.bf16.msra.mxu1 %v4421_v16  ;;  %v4664_v16 = vld [vmem:[#allocation29_spill] sm:$0xff] }
 0x6ab   :  { %2902 = vmatprep.subr.bf16.mxu0 %v4538_v21  ;;  %2943 = vmatprep.subr.bf16.mxu1 %v4425_v17 }
 0x6ae   :  { %2903 = vmatpush1.bf16.msra.mxu0 %v4540_v22  ;;  %2944 = vmatpush1.bf16.msra.mxu1 %v4427_v18 }
 0x6af   :  { %2904 = vmatprep.subr.bf16.mxu0 %v4544_v23  ;;  %2945 = vmatprep.subr.bf16.mxu1 %v4431_v19 }
 0x6b2   :  { %2905 = vmatpush1.bf16.msra.mxu0 %v4546_v12  ;;  %2946 = vmatpush1.bf16.msra.mxu1 %v4433_v20 }
 0x6b3   :  { %3495 = vmatprep.subr.bf16.mxu0 %v3700_v52 }
 0x768   :  { %v2622_v8 = vpop.f32.mrb[24].mxu0  ;;  %v2663_v42 = vpop.f32.mrb[56].mxu1 }
 0x769   :  { %v2670_v6 = vadd.f32 %v2622_v8, %v4661_v4  ;;  %v2672_v2 = vadd.f32 %v2663_v42, %v4662_v10  ;;  %v2624_v60 = vpop.f32.mrb[25].mxu0  ;;  %v2665_v0 = vpop.f32.mrb[57].mxu1 }
 0x76a   :  { %v2671_v13 = vadd.f32 %v2624_v60, %v4663_v9  ;;  %v2673_v17 = vadd.f32 %v2665_v0, %v4664_v16  ;;  %v2626_v18 = vpop.f32.mrb[26].mxu0  ;;  %v2667_v19 = vpop.f32.mrb[58].mxu1 }
 0x76b   :  { %v2674_v53 = vmul.f32 0.5, %v2670_v6  ;;  %v2627_v31 = vpop.f32.mrb[27].mxu0  ;;  %v2668_v47 = vpop.f32.mrb[59].mxu1  ;;  %v3474_v18 = vld [vmem:[%s4636_s6] ss:$0 sm:$0xff] }
 0x76c   :  { %v2678_v20 = vmul.f32 0.5, %v2671_v13  ;;  %v2683_v59 = vmul.f32 0.5, %v2673_v17 }
 0x76d   :  { %3768 = vtanh.f32 %v2674_v53 }
 0x76e   :  { %3770 = vtanh.f32 %v2678_v20 }
 0x76f   :  { %3772 = vtanh.f32 %v2672_v2 }
 0x770   :  { %3774 = vtanh.f32 %v2683_v59 }
 0x777   :  { %v3769_v37 = vpop.eup %3768 }
 0x778   :  { %v3771_v51 = vpop.eup %3770  ;;  %v2676_v32 = vmul.f32 0.5, %v3769_v37 }
 0x779   :  { %v2680_v44 = vmul.f32 0.5, %v3771_v51  ;;  %v3773_v40 = vpop.eup %3772 }
 0x77a   :  { %v2677_v35 = vadd.f32 0.5, %v2676_v32  ;;  %v3775_v23 = vpop.eup %3774 }
 0x77b   :  { %v2681_v38 = vadd.f32 0.5, %v2680_v44  ;;  %v2685_v12 = vmul.f32 0.5, %v3775_v23 }
 0x77c   :  { %v2688_v48 = vmul.f32 %v3773_v40, %v2677_v35 }
 0x77d   :  { %v2687_v21 = vmul.f32 %v2681_v38, %v4555_v39  ;;  %v2686_v15 = vadd.f32 0.5, %v2685_v12  ;;  %v4668_v39 = vld [vmem:[#allocation31_spill] sm:$0xff] }
 0x77f   :  { %v4595_v22 = vadd.f32 %v2688_v48, %v2687_v21 }
 0x781   :  { %3776 = vtanh.f32 %v4595_v22 }
 0x78b   :  { %v3777_v58 = vpop.eup %3776 }
 0x78c   :  { %v2691_v62 = vmul.f32 %v3777_v58, %v2686_v15 }
 0x78e   :  { %v2692_v3 = vpack.c.bf16 %v2691_v62, %v2691_v62 }
 0x790   :  { %2693 = vst [vmem:[#allocation4 + $0x18] sm:$0xf] %v2692_v3  ;;  %2923 = vmatmul.mubr.bf16.vlgmr.msra.gmra.mrb[28].mxu0 %v2692_v3  ;;  %2964 = vmatmul.mubr.bf16.vlgmr.msra.gmra.mrb[60].mxu1 %v2692_v3 }
 0x791   :  { %3496 = vmatpush3.bf16.msra.mxu0 %v3700_v52  ;;  %3511 = vmatprep.mubr.bf16.mxu0 %v2999_v11 }
 0x792   :  { %3497 = vmatprep.subr.bf16.mxu0 %v3701_v7 }
 0x795   :  { %3498 = vmatpush3.bf16.msra.mxu0 %v3701_v7 }
 0x796   :  { %3499 = vmatprep.subr.bf16.mxu0 %v3702_v5 }
 0x799   :  { %3500 = vmatpush3.bf16.msra.mxu0 %v3702_v5 }
 0x79a   :  { %3501 = vmatprep.subr.bf16.mxu0 %v3703_v14 }
 0x79d   :  { %3502 = vmatpush3.bf16.msra.mxu0 %v3703_v14 }
 0x79e   :  { %3503 = vmatprep.subr.bf16.mxu0 %v3704_v41 }
 0x7a1   :  { %3504 = vmatpush3.bf16.msra.mxu0 %v3704_v41 }
 0x7a2   :  { %3505 = vmatprep.subr.bf16.mxu0 %v3705_v33 }
 0x7a5   :  { %3506 = vmatpush3.bf16.msra.mxu0 %v3705_v33 }
 0x7a6   :  { %3507 = vmatprep.subr.bf16.mxu0 %v3706_v36 }
 0x7a9   :  { %3508 = vmatpush3.bf16.msra.mxu0 %v3706_v36 }
 0x7aa   :  { %3509 = vmatprep.subr.bf16.mxu0 %v3707_v24 }
 0x7ad   :  { %3510 = vmatpush3.bf16.msra.mxu0 %v3707_v24 }
 0x7b0   :  { %3512 = vmatmul.mubr.bf16.vlgmr.msra.gmra.mrb[32].mxu0 %v3000_v25 }
 0x7b1   :  { %3515 = vmatprep.mubr.bf16.mxu0 %v3001_v61 }
 0x863   :  { %v2924_v26 = vpop.f32.mrb[28].mxu0  ;;  %v2965_v34 = vpop.f32.mrb[60].mxu1 }
 0x864   :  { %v2972_v28 = vadd.f32 %v2924_v26, %v4665_v27  ;;  %v2974_v30 = vadd.f32 %v2965_v34, %v4666_v29  ;;  %v2926_v63 = vpop.f32.mrb[29].mxu0  ;;  %v2967_v1 = vpop.f32.mrb[61].mxu1 }
 0x865   :  { %v2973_v56 = vadd.f32 %v2926_v63, %v4667_v46  ;;  %v2975_v57 = vadd.f32 %v2967_v1, %v4668_v39  ;;  %v2928_v55 = vpop.f32.mrb[30].mxu0  ;;  %v2969_v50 = vpop.f32.mrb[62].mxu1 }
 0x866   :  { %v2976_v43 = vmul.f32 0.5, %v2972_v28  ;;  %v2929_v49 = vpop.f32.mrb[31].mxu0  ;;  %v2970_v45 = vpop.f32.mrb[63].mxu1 }
 0x867   :  { %v2980_v54 = vmul.f32 0.5, %v2973_v56  ;;  %v2985_v52 = vmul.f32 0.5, %v2975_v57 }
 0x868   :  { %3778 = vtanh.f32 %v2976_v43 }
 0x869   :  { %3780 = vtanh.f32 %v2980_v54 }
 0x86a   :  { %3782 = vtanh.f32 %v2974_v30 }
 0x86b   :  { %3784 = vtanh.f32 %v2985_v52 }
 0x872   :  { %v3779_v8 = vpop.eup %3778 }
 0x873   :  { %v3781_v42 = vpop.eup %3780  ;;  %v2978_v4 = vmul.f32 0.5, %v3779_v8 }
 0x874   :  { %v2982_v6 = vmul.f32 0.5, %v3781_v42  ;;  %v3783_v2 = vpop.eup %3782 }
 0x875   :  { %v2979_v10 = vadd.f32 0.5, %v2978_v4  ;;  %v3785_v16 = vpop.eup %3784 }
 0x876   :  { %v2983_v60 = vadd.f32 0.5, %v2982_v6  ;;  %v2987_v17 = vmul.f32 0.5, %v3785_v16 }
 0x877   :  { %v2990_v0 = vmul.f32 %v3783_v2, %v2979_v10 }
 0x878   :  { %v2989_v9 = vmul.f32 %v2983_v60, %v4595_v22  ;;  %v2988_v47 = vadd.f32 0.5, %v2987_v17 }
 0x87a   :  { %v2991_v13 = vadd.f32 %v2990_v0, %v2989_v9 }
 0x87c   :  { %3786 = vtanh.f32 %v2991_v13 }
 0x883   :  { %v3513_v19 = vpop.f32.mrb[32].mxu0 }
 0x884   :  { %v3117_v53 = vadd.f32 %v3513_v19, %v3474_v18  ;;  %v3108_v31 = vpop.f32.mrb[33].mxu0 }
 0x885   :  { %v3109_v20 = vadd.f32 %v3474_v18, %v3108_v31  ;;  %v3514_v59 = vpop.f32.mrb[34].mxu0 }
 0x886   :  { %v3787_v37 = vpop.eup %3786  ;;  %3141 = vst [vmem:[%s4637_s7 + $0x10] sm:$0xff] %v3117_v53  ;;  %v3120_v51 = vadd.f32 %v3514_v59, %v3474_v18  ;;  %v3111_v32 = vpop.f32.mrb[35].mxu0 }
 0x887   :  { %v2993_v44 = vmul.f32 %v3787_v37, %v2988_v47  ;;  %3139 = vst [vmem:[%s4637_s7] sm:$0xff] %v3109_v20  ;;  %v3112_v35 = vadd.f32 %v3474_v18, %v3111_v32 }
 0x888   :  { %3142 = vst [vmem:[%s4637_s7 + $0x18] sm:$0xff] %v3120_v51 }
 0x889   :  { %v2994_v40 = vpack.c.bf16 %v2993_v44, %v2993_v44  ;;  %3140 = vst [vmem:[%s4637_s7 + $0x8] sm:$0xff] %v3112_v35 }
 0x88b   :  { %v2996_v38 = vrot.slane %v2994_v40, 4 }
 0x88d   :  { %2998 = vst [vmem:[#allocation4 + $0x18] sm:$0xf0] %v2996_v38 }
 0x894   :  { %v3002_v48 = vld [vmem:[#allocation4 + $0x18] sm:$0xff] }
 0x895   :  { %3516 = vmatmul.mubr.bf16.gmra.mrb[36].mxu0 %v3002_v48 }
 0x968   :  { %v3517_v21 = vpop.f32.mrb[36].mxu0 }
 0x969   :  { %v3133_v22 = vadd.f32 %v3517_v21, %v3474_v18  ;;  %v3124_v23 = vpop.f32.mrb[37].mxu0 }
 0x96a   :  { %v3125_v12 = vadd.f32 %v3474_v18, %v3124_v23  ;;  %v3518_v15 = vpop.f32.mrb[38].mxu0 }
 0x96b   :  { %3145 = vst [vmem:[%s4637_s7 + $0x30] sm:$0xff] %v3133_v22  ;;  %v3136_v58 = vadd.f32 %v3518_v15, %v3474_v18  ;;  %v3127_v62 = vpop.f32.mrb[39].mxu0 }
 0x96c   :  { %3143 = vst [vmem:[%s4637_s7 + $0x20] sm:$0xff] %v3125_v12  ;;  %v3128_v3 = vadd.f32 %v3474_v18, %v3127_v62 }
 0x96d   :  { %3146 = vst [vmem:[%s4637_s7 + $0x38] sm:$0xff] %v3136_v58 }
 0x96e   :  { %3144 = vst [vmem:[%s4637_s7 + $0x28] sm:$0xff] %v3128_v3 }
 0x96f   :  { %3151 = vsyncpa [#allocation6], 1 }
 0x970   :  { %3152 = vsyncpa [#allocation10], 1 }
 0x971   :  { %3153 = vsyncpa [#allocation13], 1 }
 0x972   :  { %3154 = vsyncpa [#allocation7], 1 }

</bundles_post_ra>
